<compile_context>
chip_gen: v5e
topology: v5e:2x2
jax: 0.10.0
libtpu: 0.0.40
codegen_flags: <defaults>
</compile_context>

<pallas_src>
import functools

import jax
import jax.numpy as jnp
from jax import lax
from jax.experimental import pallas as pl
from jax.experimental.pallas import tpu as pltpu


def _round_up(x, m):
    return (x + m - 1) // m * m


def _vmem_limit_bytes(frac=0.75):
    """Generation-aware VMEM limit (leave headroom for Mosaic scratch/semaphores)."""
    try:
        cap = pltpu.get_tpu_info().vmem_capacity_bytes
    except Exception:
        cap = 64 * 1024 * 1024
    return int(cap * frac)


# --------------------------------------------------------------------------- kernel
def _conv_plane_kernel(x_ref, w_ref, shift_ref, o_ref, acc_ref, *,
                       k, wp, m_rows, cin_p, fold_taps):
    """One (n, d_out) output plane for one kd kernel-depth offset.

    x_ref:     (rows_in, Cin_p)          bf16  flattened padded input plane (d_out + kd)
    w_ref:     (k, k*k*Cin_p, Cout_p)    bf16  scale-folded weights, VMEM-resident
    shift_ref: (1, Cout_p)               f32   folded conv-bias + BN shift
    o_ref:     (m_rows, Cout_p)                output plane rows (= Hout * Wpad)
    acc_ref:   (m_rows, Cout_p)          f32   accumulator, persists across kd
    """
    kd = pl.program_id(2)

    @pl.when(kd == 0)
    def _init():
        acc_ref[...] = jnp.zeros_like(acc_ref)

    a_full = x_ref[...]            # (rows_in, Cin_p) bf16, aligned full-plane load
    wk_all = w_ref[kd]             # (k*k*Cin_p, Cout_p) bf16, resident in VMEM

    if fold_taps:
        # Fold all k*k (kh,kw) taps into the contraction dim: K = k*k*Cin_p,
        # one MXU matmul and one f32 accumulate pass per kd.  Output row p of
        # tap (kh,kw) reads input row p + kh*wp + kw (static, sublane-aligned
        # for the kh*wp component because wp % 8 == 0).
        lhs = jnp.concatenate(
            [a_full[kh * wp + kw: kh * wp + kw + m_rows, :]
             for kh in range(k) for kw in range(k)],
            axis=-1)                                       # (m_rows, k*k*Cin_p)
        acc_ref[...] += jnp.dot(lhs, wk_all, preferred_element_type=jnp.float32)
    else:
        # Small-Cin path (conv1): shift the bf16 LHS (not the f32 product) and
        # accumulate each tap directly into the f32 scratch, so no big f32
        # temporaries stay live across the unrolled tap loop.
        for kh in range(k):
            for kw in range(k):
                s = kh * wp + kw
                t = kh * k + kw
                wk = wk_all[t * cin_p:(t + 1) * cin_p, :]  # (Cin_p, Cout_p)
                acc_ref[...] += jnp.dot(a_full[s:s + m_rows, :], wk,
                                        preferred_element_type=jnp.float32)

    @pl.when(kd == pl.num_programs(2) - 1)
    def _finalize():
        y = acc_ref[...] + shift_ref[...]
        o_ref[...] = jnp.maximum(y, 0.0).astype(o_ref.dtype)


# --------------------------------------------------------------------- conv wrapper
def _conv3d_bn_relu(x_ndhwc, w_folded, shift, *, k, pad, out_dtype):
    """Stride-1 Conv3d + folded BatchNorm(eval) + ReLU.

    x_ndhwc:  (N, D, H, W, C) float; C <= Cin_p of w_folded (extra channels zero-padded).
    w_folded: (k, k*k*Cin_p, Cout_p) bf16, BN scale folded in.
    shift:    (Cout_p,) f32.
    Returns (N, Dout, Hout, Wout, Cout_p) in out_dtype.
    """
    n, d, h, w, c = x_ndhwc.shape
    kkc, cout_p = w_folded.shape[1], w_folded.shape[2]
    cin_p = kkc // (k * k)
    assert w_folded.shape[0] == k and c <= cin_p

    dp, hp = d + 2 * pad, h + 2 * pad
    wp = _round_up(w + 2 * pad, 8)            # sublane-aligned flattened row stride
    do, ho = dp - k + 1, hp - k + 1
    wo = (w + 2 * pad) - k + 1
    m_rows = ho * wp                          # one output plane incl. wrapped cols
    rows_in = (hp + 1) * wp                   # extra zero H-row covers the row overhang

    # Single pad op: spatial zero pad + extra bottom H row + W alignment + channel pad.
    xp = jnp.pad(x_ndhwc.astype(jnp.bfloat16),
                 ((0, 0), (pad, pad), (pad, pad + 1),
                  (pad, wp - w - pad), (0, cin_p - c)))
    xflat = xp.reshape(n, dp, rows_in, cin_p)

    fold_taps = (cin_p % 128 == 0)            # lane-aligned tap concat -> big-K matmul

    out = pl.pallas_call(
        functools.partial(_conv_plane_kernel, k=k, wp=wp, m_rows=m_rows,
                          cin_p=cin_p, fold_taps=fold_taps),
        out_shape=jax.ShapeDtypeStruct((n, do, m_rows, cout_p), out_dtype),
        grid_spec=pltpu.PrefetchScalarGridSpec(
            num_scalar_prefetch=0,
            grid=(n, do, k),
            in_specs=[
                pl.BlockSpec((None, None, rows_in, cin_p),
                             lambda ni, di, kd: (ni, di + kd, 0, 0)),
                # Whole folded weight tensor, constant block index -> DMA'd once.
                pl.BlockSpec((k, kkc, cout_p), lambda ni, di, kd: (0, 0, 0)),
                pl.BlockSpec((1, cout_p), lambda ni, di, kd: (0, 0)),
            ],
            out_specs=pl.BlockSpec((None, None, m_rows, cout_p),
                                   lambda ni, di, kd: (ni, di, 0, 0)),
            scratch_shapes=[pltpu.VMEM((m_rows, cout_p), jnp.float32)],
        ),
        compiler_params=pltpu.CompilerParams(
            dimension_semantics=("parallel", "parallel", "arbitrary"),
            vmem_limit_bytes=_vmem_limit_bytes(),
        ),
    )(xflat, w_folded, shift[None, :])

    # (N, Do, Ho*Wp, Cout_p) -> (N, Do, Ho, Wp, Cout_p); drop wrapped/alignment cols.
    out = out.reshape(n, do, ho, wp, cout_p)[:, :, :, :wo, :]
    return out


def _fold_conv_bn(w, b, gamma, beta, mean, var, cin_p, cout_p, eps=1e-5):
    """Fold BN (eval) + conv bias into the weights.  w: (Cout, Cin, k, k, k) torch layout.
    Returns bf16 weights (k, k*k*Cin_p, Cout_p) and f32 shift (Cout_p,)."""
    cout, cin, k = w.shape[0], w.shape[1], w.shape[2]
    scale = gamma / jnp.sqrt(var + eps)                 # (Cout,)
    shift = beta - mean * scale + b * scale             # conv bias folded into BN shift
    wf = jnp.transpose(w, (2, 3, 4, 1, 0)) * scale      # (kd,kh,kw,Cin,Cout) * scale[co]
    wf = jnp.pad(wf, ((0, 0), (0, 0), (0, 0),
                      (0, cin_p - cin), (0, cout_p - cout)))
    wf = wf.reshape(k, k * k * cin_p, cout_p)           # (kh,kw,Cin_p) flattened as K
    shift = jnp.pad(shift, (0, cout_p - cout))
    return wf.astype(jnp.bfloat16), shift.astype(jnp.float32)


# ------------------------------------------------------------------------ DoubleConv
def double_conv(x_ncdhw, params, stride=1, eps=1e-5):
    """Forward of the PyTorch DoubleConv (inference BatchNorm semantics)."""
    out_ch, in_ch, k1 = params["w1"].shape[0], params["w1"].shape[1], params["w1"].shape[2]
    cin1_p = _round_up(in_ch, 8)          # sublane-friendly contraction dim for conv1
    cout_p = _round_up(out_ch, 128)       # lane-dense output channels

    w1f, s1 = _fold_conv_bn(params["w1"], params["b1"], params["g1"],
                            params["be1"], params["m1"], params["v1"],
                            cin1_p, cout_p, eps)
    # conv2 consumes conv1's channel-padded output directly (padded channels are exactly 0)
    w2f, s2 = _fold_conv_bn(params["w2"], params["b2"], params["g2"],
                            params["be2"], params["m2"], params["v2"],
                            cout_p, cout_p, eps)

    # NCDHW -> NDHWC once at the module boundary.
    x = jnp.transpose(x_ncdhw, (0, 2, 3, 4, 1))

    h = _conv3d_bn_relu(x, w1f, s1, k=k1, pad=k1 // 2, out_dtype=jnp.bfloat16)
    if stride > 1:
        # TODO(synk): strided conv1 = dense conv + subsample (exact but wasteful).
        h = h[:, ::stride, ::stride, ::stride, :]

    y = _conv3d_bn_relu(h, w2f, s2, k=3, pad=1, out_dtype=jnp.bfloat16)

    y = y[..., :out_ch].astype(jnp.float32)             # strip channel pad, f32 at boundary
    return jnp.transpose(y, (0, 4, 1, 2, 3))            # back to NCDHW


def make_double_conv_params(key, in_ch, out_ch, kernel_size=3):
    ks = jax.random.split(key, 4)
    return {
        # conv1
        "w1": 0.1 * jax.random.normal(
            ks[0], (out_ch, in_ch, kernel_size, kernel_size, kernel_size), jnp.float32),
        "b1": 0.01 * jnp.arange(out_ch, dtype=jnp.float32),
        "g1": 1.0 + 0.05 * jnp.arange(out_ch, dtype=jnp.float32),
        "be1": 0.02 * jnp.arange(out_ch, dtype=jnp.float32),
        "m1": 0.01 * jax.random.normal(ks[1], (out_ch,), jnp.float32),
        "v1": 1.0 + 0.1 * jnp.abs(jax.random.normal(ks[2], (out_ch,), jnp.float32)),
        # conv2 (always 3x3x3, padding=1)
        "w2": 0.1 * jax.random.normal(ks[3], (out_ch, out_ch, 3, 3, 3), jnp.float32),
        "b2": 0.01 * jnp.arange(out_ch, dtype=jnp.float32),
        "g2": jnp.ones((out_ch,), jnp.float32),
        "be2": jnp.zeros((out_ch,), jnp.float32),
        "m2": jnp.zeros((out_ch,), jnp.float32),
        "v2": jnp.ones((out_ch,), jnp.float32),
    }


# ---------------------------------------------------------------- pure-JAX reference
def _ref_double_conv(x, params, stride=1, eps=1e-5):
    def conv_bn_relu(x, w, b, g, be, m, v, s):
        k = w.shape[-1]
        pad = k // 2
        dn = lax.conv_dimension_numbers(x.shape, w.shape, ("NCDHW", "OIDHW", "NCDHW"))
        y = lax.conv_general_dilated(x, w, (s, s, s), [(pad, pad)] * 3,
                                     dimension_numbers=dn,
                                     precision=lax.Precision.HIGHEST)
        y = y + b[None, :, None, None, None]
        scale = g / jnp.sqrt(v + eps)
        sh = be - m * scale
        y = y * scale[None, :, None, None, None] + sh[None, :, None, None, None]
        return jnp.maximum(y, 0.0)

    h = conv_bn_relu(x, params["w1"], params["b1"], params["g1"], params["be1"],
                     params["m1"], params["v1"], stride)
    return conv_bn_relu(h, params["w2"], params["b2"], params["g2"], params["be2"],
                        params["m2"], params["v2"], 1)


if __name__ == "__main__":
    key = jax.random.PRNGKey(0)
    k_x, k_p = jax.random.split(key)

    N, Cin, D, H, W = 2, 4, 8, 8, 8
    Cout = 8
    x = jax.random.normal(k_x, (N, Cin, D, H, W), jnp.float32)   # NCDHW, like PyTorch
    params = make_double_conv_params(k_p, Cin, Cout, kernel_size=3)

    y = jax.jit(lambda xx: double_conv(xx, params, stride=1))(x)
    jax.block_until_ready(y)

    assert y.shape == (N, Cout, D, H, W), y.shape
    assert bool(jnp.all(y >= 0.0))                               # ReLU output is non-negative

    y_ref = _ref_double_conv(x, params, stride=1)
    max_err = float(jnp.max(jnp.abs(y - y_ref)))
    assert max_err < 0.3, f"max |err| vs f32 reference = {max_err}"  # bf16-MXU tolerance

    print("KERNEL_OK")
</pallas_src>

<mosaic_0001>
module attributes {stable_mosaic.version = 11 : i64} {
  func.func @_conv_plane_kernel(%arg0: i32, %arg1: i32, %arg2: i32, %arg3: memref<1x1x176x8xbf16, #tpu.memory_space<vmem>>, %arg4: memref<3x72x128xbf16, #tpu.memory_space<vmem>>, %arg5: memref<1x128xf32, #tpu.memory_space<vmem>>, %arg6: memref<1x1x128x128xbf16, #tpu.memory_space<vmem>>, %arg7: memref<128x128xf32, #tpu.memory_space<vmem>>) attributes {dimension_semantics = [#tpu.dimension_semantics<parallel>, #tpu.dimension_semantics<parallel>, #tpu.dimension_semantics<arbitrary>], iteration_bounds = array<i64: 2, 8, 3>, scalar_prefetch = 0 : i64, scratch_operands = 1 : i64, tpu.core_type = #tpu.core_type<tc>, window_params = [{transform_indices = @transform_0, window_bounds = array<i64: 1, 1, 176, 8>}, {pipeline_mode = #tpu.pipeline_mode<synchronous>, transform_indices = @transform_1, window_bounds = array<i64: 3, 72, 128>}, {pipeline_mode = #tpu.pipeline_mode<synchronous>, transform_indices = @transform_2, window_bounds = array<i64: 1, 128>}, {transform_indices = @transform_3, window_bounds = array<i64: 1, 1, 128, 128>}]} {
    %c0_i32 = arith.constant 0 : i32
    %0 = arith.cmpi eq, %arg2, %c0_i32 : i32
    %1 = arith.extui %0 : i1 to i32
    %c0_i32_0 = arith.constant 0 : i32
    %2 = arith.cmpi ne, %1, %c0_i32_0 : i32
    scf.if %2 {
      %cst_51 = arith.constant 0.000000e+00 : f32
      %65 = vector.broadcast %cst_51 : f32 to vector<128x128xf32>
      %c0_52 = arith.constant 0 : index
      %c0_53 = arith.constant 0 : index
      %66 = vector.load %arg7[%c0_52, %c0_53] : memref<128x128xf32, #tpu.memory_space<vmem>>, vector<128x128xf32>
      tpu.vector_store %arg7[%c0_52, %c0_53], %65 {strides = array<i32>} : memref<128x128xf32, #tpu.memory_space<vmem>>, vector<128x128xf32>,
    } else {
    }
    %c0 = arith.constant 0 : index
    %c0_1 = arith.constant 0 : index
    %c0_2 = arith.constant 0 : index
    %c0_3 = arith.constant 0 : index
    %3 = vector.load %arg3[%c0, %c0_1, %c0_2, %c0_3] : memref<1x1x176x8xbf16, #tpu.memory_space<vmem>>, vector<1x1x176x8xbf16>
    %4 = vector.shape_cast %3 : vector<1x1x176x8xbf16> to vector<176x8xbf16>
    %5 = arith.index_cast %arg2 : i32 to index
    %c0_4 = arith.constant 0 : index
    %c0_5 = arith.constant 0 : index
    %6 = vector.load %arg4[%5, %c0_4, %c0_5] : memref<3x72x128xbf16, #tpu.memory_space<vmem>>, vector<1x72x128xbf16>
    %7 = vector.shape_cast %6 : vector<1x72x128xbf16> to vector<72x128xbf16>
    %8 = vector.extract_strided_slice %7 {offsets = [0, 0], sizes = [8, 128], strides = [1, 1]} : vector<72x128xbf16> to vector<8x128xbf16>
    %c0_6 = arith.constant 0 : index
    %c0_7 = arith.constant 0 : index
    %9 = vector.load %arg7[%c0_6, %c0_7] : memref<128x128xf32, #tpu.memory_space<vmem>>, vector<128x128xf32>
    %10 = vector.extract_strided_slice %4 {offsets = [0, 0], sizes = [128, 8], strides = [1, 1]} : vector<176x8xbf16> to vector<128x8xbf16>
    %cst = arith.constant dense<0.000000e+00> : vector<128x128xf32>
    %11 = tpu.matmul %10, %8, %cst {dimension_numbers = #tpu.dot_dimension_numbers<[1], [0], [0], [1], [0, 0, 1, 1], [], []>} : vector<128x8xbf16>, vector<8x128xbf16>, vector<128x128xf32> -> vector<128x128xf32>
    %12 = arith.addf %9, %11 : vector<128x128xf32>
    %c0_8 = arith.constant 0 : index
    %c0_9 = arith.constant 0 : index
    %13 = vector.load %arg7[%c0_8, %c0_9] : memref<128x128xf32, #tpu.memory_space<vmem>>, vector<128x128xf32>
    tpu.vector_store %arg7[%c0_8, %c0_9], %12 {strides = array<i32>} : memref<128x128xf32, #tpu.memory_space<vmem>>, vector<128x128xf32>,
    %14 = vector.extract_strided_slice %7 {offsets = [8, 0], sizes = [8, 128], strides = [1, 1]} : vector<72x128xbf16> to vector<8x128xbf16>
    %c0_10 = arith.constant 0 : index
    %c0_11 = arith.constant 0 : index
    %15 = vector.load %arg7[%c0_10, %c0_11] : memref<128x128xf32, #tpu.memory_space<vmem>>, vector<128x128xf32>
    %16 = vector.extract_strided_slice %4 {offsets = [1, 0], sizes = [128, 8], strides = [1, 1]} : vector<176x8xbf16> to vector<128x8xbf16>
    %cst_12 = arith.constant dense<0.000000e+00> : vector<128x128xf32>
    %17 = tpu.matmul %16, %14, %cst_12 {dimension_numbers = #tpu.dot_dimension_numbers<[1], [0], [0], [1], [0, 0, 1, 1], [], []>} : vector<128x8xbf16>, vector<8x128xbf16>, vector<128x128xf32> -> vector<128x128xf32>
    %18 = arith.addf %15, %17 : vector<128x128xf32>
    %c0_13 = arith.constant 0 : index
    %c0_14 = arith.constant 0 : index
    %19 = vector.load %arg7[%c0_13, %c0_14] : memref<128x128xf32, #tpu.memory_space<vmem>>, vector<128x128xf32>
    tpu.vector_store %arg7[%c0_13, %c0_14], %18 {strides = array<i32>} : memref<128x128xf32, #tpu.memory_space<vmem>>, vector<128x128xf32>,
    %20 = vector.extract_strided_slice %7 {offsets = [16, 0], sizes = [8, 128], strides = [1, 1]} : vector<72x128xbf16> to vector<8x128xbf16>
    %c0_15 = arith.constant 0 : index
    %c0_16 = arith.constant 0 : index
    %21 = vector.load %arg7[%c0_15, %c0_16] : memref<128x128xf32, #tpu.memory_space<vmem>>, vector<128x128xf32>
    %22 = vector.extract_strided_slice %4 {offsets = [2, 0], sizes = [128, 8], strides = [1, 1]} : vector<176x8xbf16> to vector<128x8xbf16>
    %cst_17 = arith.constant dense<0.000000e+00> : vector<128x128xf32>
    %23 = tpu.matmul %22, %20, %cst_17 {dimension_numbers = #tpu.dot_dimension_numbers<[1], [0], [0], [1], [0, 0, 1, 1], [], []>} : vector<128x8xbf16>, vector<8x128xbf16>, vector<128x128xf32> -> vector<128x128xf32>
    %24 = arith.addf %21, %23 : vector<128x128xf32>
    %c0_18 = arith.constant 0 : index
    %c0_19 = arith.constant 0 : index
    %25 = vector.load %arg7[%c0_18, %c0_19] : memref<128x128xf32, #tpu.memory_space<vmem>>, vector<128x128xf32>
    tpu.vector_store %arg7[%c0_18, %c0_19], %24 {strides = array<i32>} : memref<128x128xf32, #tpu.memory_space<vmem>>, vector<128x128xf32>,
    %26 = vector.extract_strided_slice %7 {offsets = [24, 0], sizes = [8, 128], strides = [1, 1]} : vector<72x128xbf16> to vector<8x128xbf16>
    %c0_20 = arith.constant 0 : index
    %c0_21 = arith.constant 0 : index
    %27 = vector.load %arg7[%c0_20, %c0_21] : memref<128x128xf32, #tpu.memory_space<vmem>>, vector<128x128xf32>
    %28 = vector.extract_strided_slice %4 {offsets = [16, 0], sizes = [128, 8], strides = [1, 1]} : vector<176x8xbf16> to vector<128x8xbf16>
    %cst_22 = arith.constant dense<0.000000e+00> : vector<128x128xf32>
    %29 = tpu.matmul %28, %26, %cst_22 {dimension_numbers = #tpu.dot_dimension_numbers<[1], [0], [0], [1], [0, 0, 1, 1], [], []>} : vector<128x8xbf16>, vector<8x128xbf16>, vector<128x128xf32> -> vector<128x128xf32>
    %30 = arith.addf %27, %29 : vector<128x128xf32>
    %c0_23 = arith.constant 0 : index
    %c0_24 = arith.constant 0 : index
    %31 = vector.load %arg7[%c0_23, %c0_24] : memref<128x128xf32, #tpu.memory_space<vmem>>, vector<128x128xf32>
    tpu.vector_store %arg7[%c0_23, %c0_24], %30 {strides = array<i32>} : memref<128x128xf32, #tpu.memory_space<vmem>>, vector<128x128xf32>,
    %32 = vector.extract_strided_slice %7 {offsets = [32, 0], sizes = [8, 128], strides = [1, 1]} : vector<72x128xbf16> to vector<8x128xbf16>
    %c0_25 = arith.constant 0 : index
    %c0_26 = arith.constant 0 : index
    %33 = vector.load %arg7[%c0_25, %c0_26] : memref<128x128xf32, #tpu.memory_space<vmem>>, vector<128x128xf32>
    %34 = vector.extract_strided_slice %4 {offsets = [17, 0], sizes = [128, 8], strides = [1, 1]} : vector<176x8xbf16> to vector<128x8xbf16>
    %cst_27 = arith.constant dense<0.000000e+00> : vector<128x128xf32>
    %35 = tpu.matmul %34, %32, %cst_27 {dimension_numbers = #tpu.dot_dimension_numbers<[1], [0], [0], [1], [0, 0, 1, 1], [], []>} : vector<128x8xbf16>, vector<8x128xbf16>, vector<128x128xf32> -> vector<128x128xf32>
    %36 = arith.addf %33, %35 : vector<128x128xf32>
    %c0_28 = arith.constant 0 : index
    %c0_29 = arith.constant 0 : index
    %37 = vector.load %arg7[%c0_28, %c0_29] : memref<128x128xf32, #tpu.memory_space<vmem>>, vector<128x128xf32>
    tpu.vector_store %arg7[%c0_28, %c0_29], %36 {strides = array<i32>} : memref<128x128xf32, #tpu.memory_space<vmem>>, vector<128x128xf32>,
    %38 = vector.extract_strided_slice %7 {offsets = [40, 0], sizes = [8, 128], strides = [1, 1]} : vector<72x128xbf16> to vector<8x128xbf16>
    %c0_30 = arith.constant 0 : index
    %c0_31 = arith.constant 0 : index
    %39 = vector.load %arg7[%c0_30, %c0_31] : memref<128x128xf32, #tpu.memory_space<vmem>>, vector<128x128xf32>
    %40 = vector.extract_strided_slice %4 {offsets = [18, 0], sizes = [128, 8], strides = [1, 1]} : vector<176x8xbf16> to vector<128x8xbf16>
    %cst_32 = arith.constant dense<0.000000e+00> : vector<128x128xf32>
    %41 = tpu.matmul %40, %38, %cst_32 {dimension_numbers = #tpu.dot_dimension_numbers<[1], [0], [0], [1], [0, 0, 1, 1], [], []>} : vector<128x8xbf16>, vector<8x128xbf16>, vector<128x128xf32> -> vector<128x128xf32>
    %42 = arith.addf %39, %41 : vector<128x128xf32>
    %c0_33 = arith.constant 0 : index
    %c0_34 = arith.constant 0 : index
    %43 = vector.load %arg7[%c0_33, %c0_34] : memref<128x128xf32, #tpu.memory_space<vmem>>, vector<128x128xf32>
    tpu.vector_store %arg7[%c0_33, %c0_34], %42 {strides = array<i32>} : memref<128x128xf32, #tpu.memory_space<vmem>>, vector<128x128xf32>,
    %44 = vector.extract_strided_slice %7 {offsets = [48, 0], sizes = [8, 128], strides = [1, 1]} : vector<72x128xbf16> to vector<8x128xbf16>
    %c0_35 = arith.constant 0 : index
    %c0_36 = arith.constant 0 : index
    %45 = vector.load %arg7[%c0_35, %c0_36] : memref<128x128xf32, #tpu.memory_space<vmem>>, vector<128x128xf32>
    %46 = vector.extract_strided_slice %4 {offsets = [32, 0], sizes = [128, 8], strides = [1, 1]} : vector<176x8xbf16> to vector<128x8xbf16>
    %cst_37 = arith.constant dense<0.000000e+00> : vector<128x128xf32>
    %47 = tpu.matmul %46, %44, %cst_37 {dimension_numbers = #tpu.dot_dimension_numbers<[1], [0], [0], [1], [0, 0, 1, 1], [], []>} : vector<128x8xbf16>, vector<8x128xbf16>, vector<128x128xf32> -> vector<128x128xf32>
    %48 = arith.addf %45, %47 : vector<128x128xf32>
    %c0_38 = arith.constant 0 : index
    %c0_39 = arith.constant 0 : index
    %49 = vector.load %arg7[%c0_38, %c0_39] : memref<128x128xf32, #tpu.memory_space<vmem>>, vector<128x128xf32>
    tpu.vector_store %arg7[%c0_38, %c0_39], %48 {strides = array<i32>} : memref<128x128xf32, #tpu.memory_space<vmem>>, vector<128x128xf32>,
    %50 = vector.extract_strided_slice %7 {offsets = [56, 0], sizes = [8, 128], strides = [1, 1]} : vector<72x128xbf16> to vector<8x128xbf16>
    %c0_40 = arith.constant 0 : index
    %c0_41 = arith.constant 0 : index
    %51 = vector.load %arg7[%c0_40, %c0_41] : memref<128x128xf32, #tpu.memory_space<vmem>>, vector<128x128xf32>
    %52 = vector.extract_strided_slice %4 {offsets = [33, 0], sizes = [128, 8], strides = [1, 1]} : vector<176x8xbf16> to vector<128x8xbf16>
    %cst_42 = arith.constant dense<0.000000e+00> : vector<128x128xf32>
    %53 = tpu.matmul %52, %50, %cst_42 {dimension_numbers = #tpu.dot_dimension_numbers<[1], [0], [0], [1], [0, 0, 1, 1], [], []>} : vector<128x8xbf16>, vector<8x128xbf16>, vector<128x128xf32> -> vector<128x128xf32>
    %54 = arith.addf %51, %53 : vector<128x128xf32>
    %c0_43 = arith.constant 0 : index
    %c0_44 = arith.constant 0 : index
    %55 = vector.load %arg7[%c0_43, %c0_44] : memref<128x128xf32, #tpu.memory_space<vmem>>, vector<128x128xf32>
    tpu.vector_store %arg7[%c0_43, %c0_44], %54 {strides = array<i32>} : memref<128x128xf32, #tpu.memory_space<vmem>>, vector<128x128xf32>,
    %56 = vector.extract_strided_slice %7 {offsets = [64, 0], sizes = [8, 128], strides = [1, 1]} : vector<72x128xbf16> to vector<8x128xbf16>
    %c0_45 = arith.constant 0 : index
    %c0_46 = arith.constant 0 : index
    %57 = vector.load %arg7[%c0_45, %c0_46] : memref<128x128xf32, #tpu.memory_space<vmem>>, vector<128x128xf32>
    %58 = vector.extract_strided_slice %4 {offsets = [34, 0], sizes = [128, 8], strides = [1, 1]} : vector<176x8xbf16> to vector<128x8xbf16>
    %cst_47 = arith.constant dense<0.000000e+00> : vector<128x128xf32>
    %59 = tpu.matmul %58, %56, %cst_47 {dimension_numbers = #tpu.dot_dimension_numbers<[1], [0], [0], [1], [0, 0, 1, 1], [], []>} : vector<128x8xbf16>, vector<8x128xbf16>, vector<128x128xf32> -> vector<128x128xf32>
    %60 = arith.addf %57, %59 : vector<128x128xf32>
    %c0_48 = arith.constant 0 : index
    %c0_49 = arith.constant 0 : index
    %61 = vector.load %arg7[%c0_48, %c0_49] : memref<128x128xf32, #tpu.memory_space<vmem>>, vector<128x128xf32>
    tpu.vector_store %arg7[%c0_48, %c0_49], %60 {strides = array<i32>} : memref<128x128xf32, #tpu.memory_space<vmem>>, vector<128x128xf32>,
    %c2_i32 = arith.constant 2 : i32
    %62 = arith.cmpi eq, %arg2, %c2_i32 : i32
    %63 = arith.extui %62 : i1 to i32
    %c0_i32_50 = arith.constant 0 : i32
    %64 = arith.cmpi ne, %63, %c0_i32_50 : i32
    scf.if %64 {
      %c0_51 = arith.constant 0 : index
      %c0_52 = arith.constant 0 : index
      %65 = vector.load %arg7[%c0_51, %c0_52] : memref<128x128xf32, #tpu.memory_space<vmem>>, vector<128x128xf32>
      %c0_53 = arith.constant 0 : index
      %c0_54 = arith.constant 0 : index
      %66 = vector.load %arg5[%c0_53, %c0_54] : memref<1x128xf32, #tpu.memory_space<vmem>>, vector<1x128xf32>
      %67 = vector.broadcast %66 : vector<1x128xf32> to vector<128x128xf32>
      %68 = arith.addf %65, %67 : vector<128x128xf32>
      %cst_55 = arith.constant 0.000000e+00 : f32
      %69 = vector.broadcast %cst_55 : f32 to vector<128x128xf32>
      %70 = arith.maximumf %68, %69 : vector<128x128xf32>
      %71 = arith.truncf %70 : vector<128x128xf32> to vector<128x128xbf16>
      %c0_56 = arith.constant 0 : index
      %c0_57 = arith.constant 0 : index
      %c0_58 = arith.constant 0 : index
      %c0_59 = arith.constant 0 : index
      %72 = vector.load %arg6[%c0_56, %c0_57, %c0_58, %c0_59] : memref<1x1x128x128xbf16, #tpu.memory_space<vmem>>, vector<1x1x128x128xbf16>
      %73 = vector.shape_cast %72 : vector<1x1x128x128xbf16> to vector<128x128xbf16>
      %74 = vector.shape_cast %71 : vector<128x128xbf16> to vector<1x1x128x128xbf16>
      tpu.vector_store %arg6[%c0_56, %c0_57, %c0_58, %c0_59], %74 {strides = array<i32>} : memref<1x1x128x128xbf16, #tpu.memory_space<vmem>>, vector<1x1x128x128xbf16>,
    } else {
    }
    return
  }
  func.func @transform_0(%arg0: i32, %arg1: i32, %arg2: i32) -> (i32, i32, i32, i32) {
    %0 = arith.addi %arg1, %arg2 : i32
    %c0_i32 = arith.constant 0 : i32
    %c0_i32_0 = arith.constant 0 : i32
    %c0_i32_1 = arith.constant 0 : i32
    return %arg0, %0, %c0_i32, %c0_i32_0 : i32, i32, i32, i32
  }
  func.func @transform_1(%arg0: i32, %arg1: i32, %arg2: i32) -> (i32, i32, i32) {
    %c0_i32 = arith.constant 0 : i32
    %c0_i32_0 = arith.constant 0 : i32
    %c0_i32_1 = arith.constant 0 : i32
    %c0_i32_2 = arith.constant 0 : i32
    return %c0_i32, %c0_i32_0, %c0_i32_1 : i32, i32, i32
  }
  func.func @transform_2(%arg0: i32, %arg1: i32, %arg2: i32) -> (i32, i32) {
    %c0_i32 = arith.constant 0 : i32
    %c0_i32_0 = arith.constant 0 : i32
    %c0_i32_1 = arith.constant 0 : i32
    return %c0_i32, %c0_i32_0 : i32, i32
  }
  func.func @transform_3(%arg0: i32, %arg1: i32, %arg2: i32) -> (i32, i32, i32, i32) {
    %c0_i32 = arith.constant 0 : i32
    %c0_i32_0 = arith.constant 0 : i32
    %c0_i32_1 = arith.constant 0 : i32
    return %arg0, %arg1, %c0_i32, %c0_i32_0 : i32, i32, i32, i32
  }
}

module attributes {stable_mosaic.version = 11 : i64} {
  func.func @_conv_plane_kernel(%arg0: i32, %arg1: i32, %arg2: i32, %arg3: memref<1x1x176x128xbf16, #tpu.memory_space<vmem>>, %arg4: memref<3x1152x128xbf16, #tpu.memory_space<vmem>>, %arg5: memref<1x128xf32, #tpu.memory_space<vmem>>, %arg6: memref<1x1x128x128xbf16, #tpu.memory_space<vmem>>, %arg7: memref<128x128xf32, #tpu.memory_space<vmem>>) attributes {dimension_semantics = [#tpu.dimension_semantics<parallel>, #tpu.dimension_semantics<parallel>, #tpu.dimension_semantics<arbitrary>], iteration_bounds = array<i64: 2, 8, 3>, scalar_prefetch = 0 : i64, scratch_operands = 1 : i64, tpu.core_type = #tpu.core_type<tc>, window_params = [{transform_indices = @transform_0, window_bounds = array<i64: 1, 1, 176, 128>}, {pipeline_mode = #tpu.pipeline_mode<synchronous>, transform_indices = @transform_1, window_bounds = array<i64: 3, 1152, 128>}, {pipeline_mode = #tpu.pipeline_mode<synchronous>, transform_indices = @transform_2, window_bounds = array<i64: 1, 128>}, {transform_indices = @transform_3, window_bounds = array<i64: 1, 1, 128, 128>}]} {
    %c0_i32 = arith.constant 0 : i32
    %0 = arith.cmpi eq, %arg2, %c0_i32 : i32
    %1 = arith.extui %0 : i1 to i32
    %c0_i32_0 = arith.constant 0 : i32
    %2 = arith.cmpi ne, %1, %c0_i32_0 : i32
    scf.if %2 {
      %cst_11 = arith.constant 0.000000e+00 : f32
      %25 = vector.broadcast %cst_11 : f32 to vector<128x128xf32>
      %c0_12 = arith.constant 0 : index
      %c0_13 = arith.constant 0 : index
      %26 = vector.load %arg7[%c0_12, %c0_13] : memref<128x128xf32, #tpu.memory_space<vmem>>, vector<128x128xf32>
      tpu.vector_store %arg7[%c0_12, %c0_13], %25 {strides = array<i32>} : memref<128x128xf32, #tpu.memory_space<vmem>>, vector<128x128xf32>,
    } else {
    }
    %c0 = arith.constant 0 : index
    %c0_1 = arith.constant 0 : index
    %c0_2 = arith.constant 0 : index
    %c0_3 = arith.constant 0 : index
    %3 = vector.load %arg3[%c0, %c0_1, %c0_2, %c0_3] : memref<1x1x176x128xbf16, #tpu.memory_space<vmem>>, vector<1x1x176x128xbf16>
    %4 = vector.shape_cast %3 : vector<1x1x176x128xbf16> to vector<176x128xbf16>
    %5 = arith.index_cast %arg2 : i32 to index
    %c0_4 = arith.constant 0 : index
    %c0_5 = arith.constant 0 : index
    %6 = vector.load %arg4[%5, %c0_4, %c0_5] : memref<3x1152x128xbf16, #tpu.memory_space<vmem>>, vector<1x1152x128xbf16>
    %7 = vector.shape_cast %6 : vector<1x1152x128xbf16> to vector<1152x128xbf16>
    %8 = vector.extract_strided_slice %4 {offsets = [0, 0], sizes = [128, 128], strides = [1, 1]} : vector<176x128xbf16> to vector<128x128xbf16>
    %9 = vector.extract_strided_slice %4 {offsets = [1, 0], sizes = [128, 128], strides = [1, 1]} : vector<176x128xbf16> to vector<128x128xbf16>
    %10 = vector.extract_strided_slice %4 {offsets = [2, 0], sizes = [128, 128], strides = [1, 1]} : vector<176x128xbf16> to vector<128x128xbf16>
    %11 = vector.extract_strided_slice %4 {offsets = [16, 0], sizes = [128, 128], strides = [1, 1]} : vector<176x128xbf16> to vector<128x128xbf16>
    %12 = vector.extract_strided_slice %4 {offsets = [17, 0], sizes = [128, 128], strides = [1, 1]} : vector<176x128xbf16> to vector<128x128xbf16>
    %13 = vector.extract_strided_slice %4 {offsets = [18, 0], sizes = [128, 128], strides = [1, 1]} : vector<176x128xbf16> to vector<128x128xbf16>
    %14 = vector.extract_strided_slice %4 {offsets = [32, 0], sizes = [128, 128], strides = [1, 1]} : vector<176x128xbf16> to vector<128x128xbf16>
    %15 = vector.extract_strided_slice %4 {offsets = [33, 0], sizes = [128, 128], strides = [1, 1]} : vector<176x128xbf16> to vector<128x128xbf16>
    %16 = vector.extract_strided_slice %4 {offsets = [34, 0], sizes = [128, 128], strides = [1, 1]} : vector<176x128xbf16> to vector<128x128xbf16>
    %17 = tpu.concatenate %8, %9, %10, %11, %12, %13, %14, %15, %16 in 1 : vector<128x128xbf16>, vector<128x128xbf16>, vector<128x128xbf16>, vector<128x128xbf16>, vector<128x128xbf16>, vector<128x128xbf16>, vector<128x128xbf16>, vector<128x128xbf16>, vector<128x128xbf16> -> vector<128x1152xbf16>
    %c0_6 = arith.constant 0 : index
    %c0_7 = arith.constant 0 : index
    %18 = vector.load %arg7[%c0_6, %c0_7] : memref<128x128xf32, #tpu.memory_space<vmem>>, vector<128x128xf32>
    %cst = arith.constant dense<0.000000e+00> : vector<128x128xf32>
    %19 = tpu.matmul %17, %7, %cst {dimension_numbers = #tpu.dot_dimension_numbers<[1], [0], [0], [1], [0, 0, 1, 1], [], []>} : vector<128x1152xbf16>, vector<1152x128xbf16>, vector<128x128xf32> -> vector<128x128xf32>
    %20 = arith.addf %18, %19 : vector<128x128xf32>
    %c0_8 = arith.constant 0 : index
    %c0_9 = arith.constant 0 : index
    %21 = vector.load %arg7[%c0_8, %c0_9] : memref<128x128xf32, #tpu.memory_space<vmem>>, vector<128x128xf32>
    tpu.vector_store %arg7[%c0_8, %c0_9], %20 {strides = array<i32>} : memref<128x128xf32, #tpu.memory_space<vmem>>, vector<128x128xf32>,
    %c2_i32 = arith.constant 2 : i32
    %22 = arith.cmpi eq, %arg2, %c2_i32 : i32
    %23 = arith.extui %22 : i1 to i32
    %c0_i32_10 = arith.constant 0 : i32
    %24 = arith.cmpi ne, %23, %c0_i32_10 : i32
    scf.if %24 {
      %c0_11 = arith.constant 0 : index
      %c0_12 = arith.constant 0 : index
      %25 = vector.load %arg7[%c0_11, %c0_12] : memref<128x128xf32, #tpu.memory_space<vmem>>, vector<128x128xf32>
      %c0_13 = arith.constant 0 : index
      %c0_14 = arith.constant 0 : index
      %26 = vector.load %arg5[%c0_13, %c0_14] : memref<1x128xf32, #tpu.memory_space<vmem>>, vector<1x128xf32>
      %27 = vector.broadcast %26 : vector<1x128xf32> to vector<128x128xf32>
      %28 = arith.addf %25, %27 : vector<128x128xf32>
      %cst_15 = arith.constant 0.000000e+00 : f32
      %29 = vector.broadcast %cst_15 : f32 to vector<128x128xf32>
      %30 = arith.maximumf %28, %29 : vector<128x128xf32>
      %31 = arith.truncf %30 : vector<128x128xf32> to vector<128x128xbf16>
      %c0_16 = arith.constant 0 : index
      %c0_17 = arith.constant 0 : index
      %c0_18 = arith.constant 0 : index
      %c0_19 = arith.constant 0 : index
      %32 = vector.load %arg6[%c0_16, %c0_17, %c0_18, %c0_19] : memref<1x1x128x128xbf16, #tpu.memory_space<vmem>>, vector<1x1x128x128xbf16>
      %33 = vector.shape_cast %32 : vector<1x1x128x128xbf16> to vector<128x128xbf16>
      %34 = vector.shape_cast %31 : vector<128x128xbf16> to vector<1x1x128x128xbf16>
      tpu.vector_store %arg6[%c0_16, %c0_17, %c0_18, %c0_19], %34 {strides = array<i32>} : memref<1x1x128x128xbf16, #tpu.memory_space<vmem>>, vector<1x1x128x128xbf16>,
    } else {
    }
    return
  }
  func.func @transform_0(%arg0: i32, %arg1: i32, %arg2: i32) -> (i32, i32, i32, i32) {
    %0 = arith.addi %arg1, %arg2 : i32
    %c0_i32 = arith.constant 0 : i32
    %c0_i32_0 = arith.constant 0 : i32
    %c0_i32_1 = arith.constant 0 : i32
    return %arg0, %0, %c0_i32, %c0_i32_0 : i32, i32, i32, i32
  }
  func.func @transform_1(%arg0: i32, %arg1: i32, %arg2: i32) -> (i32, i32, i32) {
    %c0_i32 = arith.constant 0 : i32
    %c0_i32_0 = arith.constant 0 : i32
    %c0_i32_1 = arith.constant 0 : i32
    %c0_i32_2 = arith.constant 0 : i32
    return %c0_i32, %c0_i32_0, %c0_i32_1 : i32, i32, i32
  }
  func.func @transform_2(%arg0: i32, %arg1: i32, %arg2: i32) -> (i32, i32) {
    %c0_i32 = arith.constant 0 : i32
    %c0_i32_0 = arith.constant 0 : i32
    %c0_i32_1 = arith.constant 0 : i32
    return %c0_i32, %c0_i32_0 : i32, i32
  }
  func.func @transform_3(%arg0: i32, %arg1: i32, %arg2: i32) -> (i32, i32, i32, i32) {
    %c0_i32 = arith.constant 0 : i32
    %c0_i32_0 = arith.constant 0 : i32
    %c0_i32_1 = arith.constant 0 : i32
    return %arg0, %arg1, %c0_i32, %c0_i32_0 : i32, i32, i32, i32
  }
}

</mosaic_0001>

<bundles_post_ra>
// kernel: _lambda_.2
= control target key start
LH: loop header
LB: loop body
LE: loop exit
PB: predicated region body
PF: predicated region fallthrough
CT: control target
= control target key end

     0   :  { %s1960_s12 = smov 0   ;;  %s1962_s13 = smov 0   ;;  %s2408_s0 = inlined_call_operand.vmem [shape: bf16[2,10,176,8], index: 0, kind: input, shape index: {}]   ;;  %s2409_s1 = inlined_call_operand.vmem [shape: bf16[3,72,128], index: 1, kind: input, shape index: {}]   ;;  %s2410_s2 = inlined_call_operand.vmem [shape: f32[1,128], index: 2, kind: input, shape index: {}]   ;;  %s2411_s3 = inlined_call_operand.vmem [shape: bf16[2,8,128,128], index: 3, kind: output, shape index: {}]  }
   0x1   :  { %s1964_s14 = smov 0   ;;  %s1966_s15 = smov 0  }
   0x2   :  { %s1968_s16 = smov 0   ;;  %s1970_s17 = smov 0  }
   0x3   :  { %s1972_s18 = smov 0  }
   0x4 LB: > { %s25_s19 = sadd.s32 1, %s1925_s15  ;;  %s28_s20 = sadd.s32 1, %s1929_s16  ;;  %s1937_s18 = sphi %s1972_s18, %s13_s18   ;;  %s1933_s17 = sphi %s1970_s17, %s2417_s17   ;;  %s1929_s16 = sphi %s1968_s16, %s2416_s16   ;;  %s1925_s15 = sphi %s1966_s15, %s2415_s15   ;;  %s1921_s14 = sphi %s1964_s14, %s2414_s14   ;;  %s1917_s13 = sphi %s1962_s13, %s2413_s13   ;;  %s1913_s12 = sphi %s1960_s12, %s2412_s12  }
   0x5   : > { %p26_p0 = scmp.ge.s32.totalorder %s25_s19, 3  ;;  %p1640_p1 = scmp.ge.s32.totalorder %s1937_s18, 1 }
   0x6   : > { %p168_p2 = scmp.lt.s32.totalorder %s1937_s18, 49  ;;  %s32_s21 = sadd.s32 1, %s1933_s17 }
   0x7   : > { %s2419_s19 = smov (%p26_p0, %s25_s19), 0  ;;  %s2421_s20 = smov (!%p26_p0, %s28_s20), %s1929_s16 }
   0x8   : > { %p169_p3 = pnand %p1640_p1, %p168_p2  ;;  %p30_p4 = scmp.ge.s32.totalorder %s2421_s20, 8 }
   0x9   : > { %s201_s22 = sadd.s32 (!%p169_p3), %s1913_s12, %s1917_s13  ;;  %p202_p6 = scmp.lt.s32.totalorder (!%p169_p3), %s1921_s14, 1 }
   0xa   : > { %s2423_s20 = smov (%p30_p4, %s2421_s20), 0  ;;  %s2425_s21 = smov (!%p30_p4, %s32_s21), %s1933_s17 }
   0xb   : > { %p34_p5 = scmp.ge.s32.totalorder %s2425_s21, 2  ;;  %172 = sbr.rel (%p169_p3) target bundleno = 485 (0x1e5), region = 32 }
   0xc   : > { %p204_p7 = scmp.lt.s32.totalorder (!%p169_p3), %s201_s22, 9  ;;  %p214_p8 = scmp.lt.s32.totalorder (!%p169_p3), %s1917_s13, 7 }
   0xd   : > { %s2427_s21 = smov (%p34_p5, %s2425_s21), 0  ;;  %p1645_p9 = scmp.ne.s32.totalorder (!%p169_p3), %s1913_s12, 0 }
  0x10   : > { %s2429_s14 = smov (!%p202_p6, %s1921_s14), 1  ;;  %s2431_s22 = smov (!%p204_p7, %s201_s22), 9 }
  0x11   : > { %s1824_s23 = smul.u32 220, %s2429_s14  ;;  %s1643_s25 = sshll.u32 %s2429_s14, 7 }
  0x12   : > { %s1823_s24 = smul.u32 22, %s2431_s22  ;;  %s2433_s13 = smov (!%p214_p8, %s1917_s13), 7 }
  0x13   : > { %s1642_s28 = sshll.u32 %s2433_s13, 4  ;;  %225 = sbr.rel (%p1645_p9) target bundleno = 41 (0x29), region = 36 }
  0x14   : > { %s208_s26 = sadd.s32 %s1824_s23, %s1823_s24  ;;  %s218_s5 = sadd.s32 %s1643_s25, %s1642_s28 }
  0x15   : > { %s1641_s27 = sshll.u32 %s208_s26, 2  ;;  %s1644_s6 = sshll.u32 %s218_s5, 2 }
  0x16   : > { %s2013_s4 = scalar_lea.vmem %s2408_s0, %s1641_s27  ;;  %s2018_s9 = scalar_lea.vmem %s2411_s3, %s1644_s6 }
  0x18   : > { %v1939_v0 = vmov 0.0  }
  0x19   : > { %226 = vst [vmem:[#allocation2 + $0x30] sm:$0xff] %v1939_v0 }
  0x1a   : > { %227 = vst [vmem:[#allocation2] sm:$0xff] %v1939_v0 }
  0x1b   : > { %228 = vst [vmem:[#allocation2 + $0x58] sm:$0xff] %v1939_v0 }
  0x1c   : > { %229 = vst [vmem:[#allocation2 + $0x18] sm:$0xff] %v1939_v0 }
  0x1d   : > { %230 = vst [vmem:[#allocation2 + $0x50] sm:$0xff] %v1939_v0 }
  0x1e   : > { %231 = vst [vmem:[#allocation2 + $0x68] sm:$0xff] %v1939_v0 }
  0x1f   : > { %232 = vst [vmem:[#allocation2 + $0x8] sm:$0xff] %v1939_v0 }
  0x20   : > { %233 = vst [vmem:[#allocation2 + $0x48] sm:$0xff] %v1939_v0 }
  0x21   : > { %234 = vst [vmem:[#allocation2 + $0x40] sm:$0xff] %v1939_v0 }
  0x22   : > { %235 = vst [vmem:[#allocation2 + $0x20] sm:$0xff] %v1939_v0 }
  0x23   : > { %236 = vst [vmem:[#allocation2 + $0x10] sm:$0xff] %v1939_v0 }
  0x24   : > { %237 = vst [vmem:[#allocation2 + $0x38] sm:$0xff] %v1939_v0 }
  0x25   : > { %238 = vst [vmem:[#allocation2 + $0x60] sm:$0xff] %v1939_v0 }
  0x26   : > { %239 = vst [vmem:[#allocation2 + $0x70] sm:$0xff] %v1939_v0 }
  0x27   : > { %240 = vst [vmem:[#allocation2 + $0x78] sm:$0xff] %v1939_v0 }
  0x28   : > { %241 = vst [vmem:[#allocation2 + $0x28] sm:$0xff] %v1939_v0 }
  0x29 PF: > { %s1762_s10 = smul.u32 36, %s1913_s12  ;;  %vm356_vm0 = vcmask 1043456   ;;  %v2028_v1 = vld [vmem:[%s2013_s4 + $0x10] sm:$0xff]  ;;  %v2035_v6 = vld [vmem:[%s2013_s4 + $0x20] sm:$0xff]  ;;  %vm331_vm1 = vcmask 64512   ;;  %v2061_v21 = vld [vmem:[%s2013_s4 + $0x18] sm:$0xff] }
  0x2a   : > { %v2041_v10 = vld [vmem:[%s2013_s4 + $0x30] sm:$0xff]  ;;  %v1754_v14 = vld [vmem:[%s2013_s4] sm:$0xff]  ;;  %v2064_v22 = vld [vmem:[%s2013_s4 + $0x28] sm:$0xff]  ;;  %v474_v36 = vshll.u32 %v2028_v1, 16  ;;  %vm460_vm2 = vsmask.f32 7424 }
  0x2b   : > { %s2025_s14 = scalar_lea.vmem %s2409_s1, %s1762_s10  ;;  %v2067_v23 = vld [vmem:[%s2013_s4 + $0x38] sm:$0xff]  ;;  %v1755_v24 = vld [vmem:[%s2013_s4 + $0x8] sm:$0xff]  ;;  %v463_v25 = vshll.u32 %v1754_v14, 16  ;;  %v461_v29 = vshrl.u32 %v1754_v14, 16  ;;  %v646_v32 = vrot.slane %v1754_v14, 1  ;;  %vm645_vm3 = vcmask 1046528  }
  0x2c   : > { %v266_v2 = vld [vmem:[%s2025_s14] sm:$0xf]  ;;  %v267_v3 = vld [vmem:[%s2025_s14 + $0x4] sm:$0xf]  ;;  %v268_v4 = vld [vmem:[%s2025_s14 + $0x8] sm:$0xf] }
  0x2d   : > { %v358_v5 = vsel %vm356_vm0, %v266_v2, 0  ;;  %v546_v7 = vsel %vm356_vm0, %v267_v3, 0  ;;  %v688_v8 = vsel %vm356_vm0, %v268_v4, 0  ;;  %v269_v9 = vld [vmem:[%s2025_s14 + $0xc] sm:$0xf]  ;;  %v467_v28 = vshll.u32 %v1755_v24, 16 }
  0x2e   : > { %1820 = vmatpush.bf16.msra.mxu1 %v358_v5  ;;  %1821 = vmatpush.bf16.msra.mxu2 %v358_v5  ;;  %v794_v11 = vsel %vm356_vm0, %v269_v9, 0  ;;  %v270_v12 = vld [vmem:[%s2025_s14 + $0x10] sm:$0xf]  ;;  %v271_v15 = vld [vmem:[%s2025_s14 + $0x14] sm:$0xf]  ;;  %v465_v30 = vrot.slane %v463_v25, 1 }
  0x2f   : > { %1822 = vmatpush.bf16.msra.mxu3 %v358_v5  ;;  %v915_v13 = vsel %vm356_vm0, %v270_v12, 0  ;;  %v272_v16 = vld [vmem:[%s2025_s14 + $0x18] sm:$0xf]  ;;  %367 = vmatpush.bf16.msra.mxu0 %v358_v5  ;;  %v1025_v17 = vsel %vm356_vm0, %v271_v15, 0  ;;  %v273_v19 = vld [vmem:[%s2025_s14 + $0x1c] sm:$0xf] }
  0x30   : > { %v1131_v18 = vsel %vm356_vm0, %v272_v16, 0  ;;  %v1252_v20 = vsel %vm356_vm0, %v273_v19, 0  ;;  %v274_v26 = vld [vmem:[%s2025_s14 + $0x20] sm:$0xf]  ;;  %v469_v31 = vrot.slane %v467_v28, 1  ;;  %v466_v33 = vor.u32 %v465_v30, %v461_v29  ;;  %v2187_v28 = vld [vmem:[%s2013_s4 + $0x48] sm:$0xff]  }
  0x31   : > { %1681 = vmatmul.msk.bf16.vlgmr.msra.gmra.mxu1 %vm331_vm1, %v2028_v1  ;;  %1683 = vmatmul.msk.bf16.vlgmr.msra.gmra.mxu2 %vm331_vm1, %v2035_v6  ;;  %v1362_v27 = vsel %vm356_vm0, %v274_v26, 0  ;;  %v647_v34 = vrot.slane %v1755_v24, 1  ;;  %v471_v35 = vshrl.u32 %v1755_v24, 16  ;;  %v476_v40 = vrot.slane %v474_v36, 1  ;;  %v2172_v16 = vld [vmem:[%s2013_s4 + $0x40] sm:$0xff]   ;;  %p1751_p10 = scmp.ne.s32.totalorder %s1913_s12, 2 }
  0x32   : > { %555 = vmatpush.bf16.msrb.mxu1 %v546_v7  ;;  %697 = vmatpush.bf16.msrb.mxu2 %v688_v8  ;;  %v470_v37 = vsel %vm460_vm2, %v466_v33, %v469_v31  ;;  %v649_v42 = vrot.slane %v2028_v1, 1  ;;  %v478_v43 = vshrl.u32 %v2028_v1, 16  ;;  %v481_v44 = vshll.u32 %v2061_v21, 16 }
  0x33   : > { %803 = vmatpush.bf16.msrb.mxu3 %v794_v11  ;;  %924 = vmatpush.bf16.msrb.mxu0 %v915_v13  ;;  %v648_v38 = vsel %vm645_vm3, %v646_v32, %v647_v34  ;;  %v473_v39 = vor.u32 %v471_v35, %v469_v31  ;;  %v651_v49 = vrot.slane %v2061_v21, 1  ;;  %v485_v50 = vshrl.u32 %v2061_v21, 16 }
  0x34   : > { %1685 = vmatmul.msk.bf16.vlgmr.msra.gmra.mxu3 %vm331_vm1, %v2041_v10  ;;  %1679 = vmatmul.msk.bf16.vlgmr.msra.gmra.mxu0 %vm331_vm1, %v1754_v14  ;;  %v2091_v45 = vsel %vm645_vm3, %v647_v34, %v649_v42  ;;  %v480_v46 = vor.u32 %v478_v43, %v476_v40  ;;  %v483_v47 = vrot.slane %v481_v44, 1  ;;  %v488_v51 = vshll.u32 %v2035_v6, 16 }
  0x35   : > { %v477_v41 = vsel %vm460_vm2, %v473_v39, %v476_v40  ;;  %v2107_v52 = vsel %vm645_vm3, %v649_v42, %v651_v49  ;;  %v653_v56 = vrot.slane %v2035_v6, 1  ;;  %v492_v57 = vshrl.u32 %v2035_v6, 16 }
  0x36   : > { %1034 = vmatpush.bf16.msra.mxu1 %v1025_v17  ;;  %1140 = vmatpush.bf16.msra.mxu2 %v1131_v18  ;;  %v2099_v48 = vsel %vm460_vm2, %v480_v46, %v483_v47  ;;  %v487_v53 = vor.u32 %v485_v50, %v483_v47  ;;  %v490_v54 = vrot.slane %v488_v51, 1  ;;  %v495_v58 = vshll.u32 %v2064_v22, 16 }
  0x37   : > { %1261 = vmatpush.bf16.msra.mxu3 %v1252_v20  ;;  %1371 = vmatpush.bf16.msra.mxu0 %v1362_v27  ;;  %v2124_v59 = vsel %vm645_vm3, %v651_v49, %v653_v56  ;;  %v655_v63 = vrot.slane %v2064_v22, 1  ;;  %v499_v0 = vshrl.u32 %v2064_v22, 16  ;;  %v502_v2 = vshll.u32 %v2041_v10, 16 }
  0x38   : > { %v2116_v55 = vsel %vm460_vm2, %v487_v53, %v490_v54  ;;  %v494_v60 = vor.u32 %v492_v57, %v490_v54  ;;  %v497_v61 = vrot.slane %v495_v58, 1  ;;  %v657_v8 = vrot.slane %v2041_v10, 1 }
  0x39   : > { %v2141_v3 = vsel %vm645_vm3, %v653_v56, %v655_v63  ;;  %v504_v5 = vrot.slane %v502_v2, 1  ;;  %v506_v9 = vshrl.u32 %v2041_v10, 16  ;;  %v509_v11 = vshll.u32 %v2067_v23, 16 }
  0x3a   : > { %v2133_v62 = vsel %vm460_vm2, %v494_v60, %v497_v61  ;;  %v501_v4 = vor.u32 %v499_v0, %v497_v61  ;;  %v2158_v12 = vsel %vm645_vm3, %v655_v63, %v657_v8  ;;  %v2175_v17 = vrot.slane %v2067_v23, 1  ;;  %v275_v60 = vld [vmem:[#allocation2 + $0x30] sm:$0xff] }
  0x3b   : > { %v508_v13 = vor.u32 %v506_v9, %v504_v5  ;;  %v511_v14 = vrot.slane %v509_v11, 1  ;;  %v513_v18 = vshrl.u32 %v2067_v23, 16  ;;  %v896_v19 = vshll.u32 %v2172_v16, 16 }
  0x3c   : > { %v2150_v7 = vsel %vm460_vm2, %v501_v4, %v504_v5  ;;  %v1765_v25 = vunpack.c.l.b16 %v2172_v16  ;;  %v1769_v32 = vunpack.c.l.b16 %v2187_v28 }
  0x3d   : > { %v2167_v15 = vsel %vm460_vm2, %v508_v13, %v511_v14  ;;  %v515_v26 = vor.u32 %v513_v18, %v511_v14  ;;  %v898_v27 = vrot.slane %v896_v19, 1 }
  0x3e   : > { %v459_v29 = vpack.c.b16 %v1765_v25, %v1765_v25 }
  0x3f   : > { %v2196_v31 = vsel %vm460_vm2, %v515_v26, %v898_v27 }
  0x40   : > { %v517_v36 = vshll.u32 %v459_v29, 16  ;;  %v661_v39 = vrot.slane %v459_v29, 1 }
  0x41   : > { %1682 = vmatmul.msk.bf16.gmra.mxu1 %vm331_vm1, %v2061_v21  ;;  %1684 = vmatmul.msk.bf16.gmra.mxu2 %vm331_vm1, %v2064_v22 }
  0x42   : > { %v662_v49 = vsel %vm645_vm3, %v2175_v17, %v661_v39 }
  0x44   : > { %1686 = vmatmul.msk.bf16.gmra.mxu3 %vm331_vm1, %v2067_v23  ;;  %1680 = vmatmul.msk.bf16.gmra.mxu0 %vm331_vm1, %v1755_v24 }
  0x51   : > { %1687 = vmatmul.msk.bf16.vlgmr.msrb.gmra.mxu1 %vm331_vm1, %v470_v37  ;;  %1695 = vmatmul.msk.bf16.vlgmr.msrb.gmra.mxu2 %vm331_vm1, %v648_v38  ;;  %v2207_v37 = vpack.c.b16 %v1769_v32, %v1769_v32  ;;  %v519_v38 = vrot.slane %v517_v36, 1 }
  0x53   : > { %v904_v42 = vshll.u32 %v2207_v37, 16  ;;  %v520_v47 = vsel %vm460_vm2, %v515_v26, %v519_v38 }
  0x54   : > { %1703 = vmatmul.msk.bf16.vlgmr.msrb.gmra.mxu3 %vm331_vm1, %v1755_v24  ;;  %1711 = vmatmul.msk.bf16.vlgmr.msrb.gmra.mxu0 %vm331_vm1, %v477_v41  ;;  %v2183_v24 = vsel %vm645_vm3, %v657_v8, %v2175_v17  ;;  %v276_v8 = vld [vmem:[#allocation2] sm:$0xff] }
  0x55   : > { %v906_v51 = vrot.slane %v904_v42, 1 }
  0x61   : > { %1688 = vmatmul.msk.bf16.gmra.mxu1 %vm331_vm1, %v477_v41  ;;  %1696 = vmatmul.msk.bf16.gmra.mxu2 %vm331_vm1, %v2091_v45  ;;  %v900_v41 = vshrl.u32 %v2172_v16, 16 }
  0x63   : > { %v2220_v50 = vor.u32 %v900_v41, %v898_v27  ;;  %v278_v41 = vld [vmem:[#allocation2 + $0x18] sm:$0xff] }
  0x64   : > { %1704 = vmatmul.msk.bf16.gmra.mxu3 %vm331_vm1, %v2028_v1  ;;  %1712 = vmatmul.msk.bf16.gmra.mxu0 %vm331_vm1, %v2099_v48 }
  0x65   : > { %v907_v54 = vsel %vm460_vm2, %v2220_v50, %v906_v51 }
  0x71   : > { %1689 = vmatmul.msk.bf16.gmra.mxu1 %vm331_vm1, %v2099_v48  ;;  %1697 = vmatmul.msk.bf16.gmra.mxu2 %vm331_vm1, %v2107_v52 }
  0x74   : > { %1705 = vmatmul.msk.bf16.gmra.mxu3 %vm331_vm1, %v2061_v21  ;;  %1713 = vmatmul.msk.bf16.gmra.mxu0 %vm331_vm1, %v2116_v55 }
  0x81   : > { %1690 = vmatmul.msk.bf16.gmra.mxu1 %vm331_vm1, %v2116_v55  ;;  %1698 = vmatmul.msk.bf16.gmra.mxu2 %vm331_vm1, %v2124_v59 }
  0x84   : > { %1706 = vmatmul.msk.bf16.gmra.mxu3 %vm331_vm1, %v2035_v6  ;;  %1714 = vmatmul.msk.bf16.gmra.mxu0 %vm331_vm1, %v2133_v62 }
  0x91   : > { %1691 = vmatmul.msk.bf16.gmra.mxu1 %vm331_vm1, %v2133_v62  ;;  %1699 = vmatmul.msk.bf16.gmra.mxu2 %vm331_vm1, %v2141_v3 }
  0x94   : > { %1707 = vmatmul.msk.bf16.gmra.mxu3 %vm331_vm1, %v2064_v22  ;;  %1715 = vmatmul.msk.bf16.gmra.mxu0 %vm331_vm1, %v2150_v7 }
  0xa1   : > { %1692 = vmatmul.msk.bf16.gmra.mxu1 %vm331_vm1, %v2150_v7  ;;  %1700 = vmatmul.msk.bf16.gmra.mxu2 %vm331_vm1, %v2158_v12 }
  0xa4   : > { %1708 = vmatmul.msk.bf16.gmra.mxu3 %vm331_vm1, %v2041_v10  ;;  %1716 = vmatmul.msk.bf16.gmra.mxu0 %vm331_vm1, %v2167_v15 }
  0xae   : > { %v2179_v20 = vpop.f32.mrf.mxu1 }
  0xb1   : > { %1693 = vmatmul.msk.bf16.gmra.mxu1 %vm331_vm1, %v2167_v15  ;;  %1701 = vmatmul.msk.bf16.gmra.mxu2 %vm331_vm1, %v2183_v24  ;;  %v369_v30 = vpop.f32.mrf.mxu0 }
  0xb2   : > { %v409_v0 = vadd.f32 %v369_v30, %v275_v60 }
  0xb4   : > { %1709 = vmatmul.msk.bf16.gmra.mxu3 %vm331_vm1, %v2067_v23  ;;  %v2199_v33 = vpop.f32.mrf.mxu2  ;;  %1717 = vmatmul.msk.bf16.gmra.mxu0 %vm331_vm1, %v2196_v31 }
  0xb6   : > { %v2205_v35 = vpop.f32.mrf.mxu1 }
  0xb7   : > { %v2201_v34 = vpop.f32.mrf.mxu3 }
  0xb9   : > { %v371_v40 = vpop.f32.mrf.mxu0 }
  0xba   : > { %v410_v13 = vadd.f32 %v371_v40, %v276_v8 }
  0xbc   : > { %v2211_v43 = vpop.f32.mrf.mxu2 }
  0xbe   : > { %v2215_v46 = vpop.f32.mrf.mxu1 }
  0xbf   : > { %v2213_v44 = vpop.f32.mrf.mxu3 }
  0xc1   : > { %1694 = vmatmul.msk.bf16.gmra.mxu1 %vm331_vm1, %v520_v47  ;;  %1702 = vmatmul.msk.bf16.gmra.mxu2 %vm331_vm1, %v662_v49  ;;  %v374_v53 = vpop.f32.mrf.mxu0 }
  0xc4   : > { %1710 = vmatmul.msk.bf16.gmra.mxu3 %vm331_vm1, %v2172_v16  ;;  %v2228_v56 = vpop.f32.mrf.mxu2  ;;  %1718 = vmatmul.msk.bf16.gmra.mxu0 %vm331_vm1, %v907_v54 }
  0xc6   : > { %v2233_v58 = vpop.f32.mrf.mxu1 }
  0xc7   : > { %v2230_v57 = vpop.f32.mrf.mxu3 }
  0xc9   : > { %v376_v61 = vpop.f32.mrf.mxu0 }
  0xca   : > { %v412_v49 = vadd.f32 %v376_v61, %v278_v41 }
  0xcc   : > { %v2235_v63 = vpop.f32.mrf.mxu2 }
  0xce   : > { %v557_v4 = vpop.f32.mrf.mxu1 }
  0xcf   : > { %v2237_v2 = vpop.f32.mrf.mxu3  ;;  %v597_v5 = vadd.f32 %v557_v4, %v409_v0 }
  0xd1   : > { %1719 = vmatmul.msk.bf16.vlgmr.msra.gmra.mxu1 %vm331_vm1, %v2091_v45  ;;  %1727 = vmatmul.msk.bf16.vlgmr.msra.gmra.mxu2 %vm331_vm1, %v2028_v1  ;;  %v926_v9 = vpop.f32.mrf.mxu0  ;;  %v277_v45 = vld [vmem:[#allocation2 + $0x58] sm:$0xff] }
  0xd2   : > { %v411_v30 = vadd.f32 %v374_v53, %v277_v45 }
  0xd4   : > { %1735 = vmatmul.msk.bf16.vlgmr.msra.gmra.mxu3 %vm331_vm1, %v2099_v48  ;;  %v699_v11 = vpop.f32.mrf.mxu2  ;;  %1743 = vmatmul.msk.bf16.vlgmr.msra.gmra.mxu0 %vm331_vm1, %v2107_v52 }
  0xd5   : > { %v739_v14 = vadd.f32 %v699_v11, %v597_v5 }
  0xd6   : > { %v559_v19 = vpop.f32.mrf.mxu1 }
  0xd7   : > { %v805_v18 = vpop.f32.mrf.mxu3  ;;  %v598_v25 = vadd.f32 %v559_v19, %v410_v13 }
  0xd8   : > { %v845_v26 = vadd.f32 %v805_v18, %v739_v14  ;;  %v280_v18 = vld [vmem:[#allocation2 + $0x68] sm:$0xff] }
  0xd9   : > { %v928_v29 = vpop.f32.mrf.mxu0 }
  0xda   : > { %v2247_v27 = vadd.f32 %v926_v9, %v845_v26 }
  0xdc   : > { %v701_v1 = vpop.f32.mrf.mxu2 }
  0xdd   : > { %v740_v32 = vadd.f32 %v701_v1, %v598_v25 }
  0xde   : > { %v562_v48 = vpop.f32.mrf.mxu1 }
  0xdf   : > { %v807_v36 = vpop.f32.mrf.mxu3  ;;  %v599_v38 = vadd.f32 %v562_v48, %v411_v30 }
  0xe0   : > { %v846_v39 = vadd.f32 %v807_v36, %v740_v32 }
  0xe1   : > { %1720 = vmatmul.msk.bf16.gmra.mxu1 %vm331_vm1, %v2107_v52  ;;  %1728 = vmatmul.msk.bf16.gmra.mxu2 %vm331_vm1, %v2061_v21  ;;  %v931_v42 = vpop.f32.mrf.mxu0  ;;  %v279_v21 = vld [vmem:[#allocation2 + $0x50] sm:$0xff] }
  0xe2   : > { %v2253_v40 = vadd.f32 %v928_v29, %v846_v39  ;;  %v413_v8 = vadd.f32 %v2179_v20, %v279_v21  ;;  %v414_v20 = vadd.f32 %v2205_v35, %v280_v18 }
  0xe4   : > { %1736 = vmatmul.msk.bf16.gmra.mxu3 %vm331_vm1, %v2116_v55  ;;  %v704_v47 = vpop.f32.mrf.mxu2  ;;  %1744 = vmatmul.msk.bf16.gmra.mxu0 %vm331_vm1, %v2124_v59 }
  0xe5   : > { %v741_v51 = vadd.f32 %v704_v47, %v599_v38  ;;  %v282_v47 = vld [vmem:[#allocation2 + $0x48] sm:$0xff] }
  0xe6   : > { %v564_v54 = vpop.f32.mrf.mxu1 }
  0xe7   : > { %v810_v53 = vpop.f32.mrf.mxu3  ;;  %v600_v60 = vadd.f32 %v564_v54, %v412_v49 }
  0xe8   : > { %v847_v52 = vadd.f32 %v810_v53, %v741_v51 }
  0xe9   : > { %v933_v4 = vpop.f32.mrf.mxu0 }
  0xea   : > { %v2259_v0 = vadd.f32 %v931_v42, %v847_v52 }
  0xec   : > { %v706_v5 = vpop.f32.mrf.mxu2 }
  0xed   : > { %v742_v9 = vadd.f32 %v706_v5, %v600_v60 }
  0xee   : > { %v567_v11 = vpop.f32.mrf.mxu1 }
  0xef   : > { %v812_v55 = vpop.f32.mrf.mxu3  ;;  %v601_v13 = vadd.f32 %v567_v11, %v413_v8 }
  0xf0   : > { %v848_v61 = vadd.f32 %v812_v55, %v742_v9 }
  0xf1   : > { %1721 = vmatmul.msk.bf16.gmra.mxu1 %vm331_vm1, %v2124_v59  ;;  %1729 = vmatmul.msk.bf16.gmra.mxu2 %vm331_vm1, %v2035_v6  ;;  %v936_v19 = vpop.f32.mrf.mxu0  ;;  %v281_v6 = vld [vmem:[#allocation2 + $0x8] sm:$0xff] }
  0xf2   : > { %v2266_v14 = vadd.f32 %v933_v4, %v848_v61  ;;  %v415_v48 = vadd.f32 %v2215_v46, %v281_v6  ;;  %v416_v46 = vadd.f32 %v2233_v58, %v282_v47  ;;  %v284_v61 = vld [vmem:[#allocation2 + $0x20] sm:$0xff] }
  0xf4   : > { %1737 = vmatmul.msk.bf16.gmra.mxu3 %vm331_vm1, %v2133_v62  ;;  %v709_v25 = vpop.f32.mrf.mxu2  ;;  %1745 = vmatmul.msk.bf16.gmra.mxu0 %vm331_vm1, %v2141_v3 }
  0xf5   : > { %v743_v26 = vadd.f32 %v709_v25, %v601_v13 }
  0xf6   : > { %v569_v29 = vpop.f32.mrf.mxu1 }
  0xf7   : > { %v815_v45 = vpop.f32.mrf.mxu3  ;;  %v602_v59 = vadd.f32 %v569_v29, %v414_v20 }
  0xf8   : > { %v849_v1 = vadd.f32 %v815_v45, %v743_v26 }
  0xf9   : > { %v938_v32 = vpop.f32.mrf.mxu0 }
  0xfa   : > { %v2273_v30 = vadd.f32 %v936_v19, %v849_v1 }
  0xfc   : > { %v711_v36 = vpop.f32.mrf.mxu2 }
  0xfd   : > { %v744_v62 = vadd.f32 %v711_v36, %v602_v59 }
  0xfe   : > { %v572_v39 = vpop.f32.mrf.mxu1 }
  0xff   : > { %v817_v38 = vpop.f32.mrf.mxu3  ;;  %v603_v41 = vadd.f32 %v572_v39, %v415_v48  ;;  %v286_v39 = vld [vmem:[#allocation2 + $0x38] sm:$0xff] }
 0x100   : > { %v850_v35 = vadd.f32 %v817_v38, %v744_v62  ;;  %v420_v47 = vadd.f32 %v2235_v63, %v286_v39 }
 0x101   : > { %1722 = vmatmul.msk.bf16.gmra.mxu1 %vm331_vm1, %v2141_v3  ;;  %1730 = vmatmul.msk.bf16.gmra.mxu2 %vm331_vm1, %v2064_v22  ;;  %v941_v49 = vpop.f32.mrf.mxu0  ;;  %v283_v22 = vld [vmem:[#allocation2 + $0x40] sm:$0xff] }
 0x102   : > { %v2280_v42 = vadd.f32 %v938_v32, %v850_v35  ;;  %v417_v8 = vadd.f32 %v2199_v33, %v283_v22  ;;  %v418_v33 = vadd.f32 %v2211_v43, %v284_v61  ;;  %v2305_v43 = vrot.slane %v2172_v16, 1  ;;  %v288_v61 = vld [vmem:[#allocation2 + $0x70] sm:$0xff] }
 0x104   : > { %1738 = vmatmul.msk.bf16.gmra.mxu3 %vm331_vm1, %v2150_v7  ;;  %v714_v51 = vpop.f32.mrf.mxu2  ;;  %1746 = vmatmul.msk.bf16.gmra.mxu0 %vm331_vm1, %v2158_v12 }
 0x105   : > { %v745_v53 = vadd.f32 %v714_v51, %v603_v41 }
 0x106   : > { %v574_v60 = vpop.f32.mrf.mxu1 }
 0x107   : > { %v820_v54 = vpop.f32.mrf.mxu3  ;;  %v604_v3 = vadd.f32 %v574_v60, %v416_v46 }
 0x108   : > { %v851_v52 = vadd.f32 %v820_v54, %v745_v53  ;;  %v1233_v53 = vshll.u32 %v2187_v28, 16 }
 0x109   : > { %v943_v4 = vpop.f32.mrf.mxu0 }
 0x10a   : > { %v2287_v21 = vadd.f32 %v941_v49, %v851_v52  ;;  %v262_v52 = vld [vmem:[%s2013_s4 + $0x50] sm:$0xf] }
 0x10c   : > { %v716_v5 = vpop.f32.mrf.mxu2 }
 0x10d   : > { %v746_v7 = vadd.f32 %v716_v5, %v604_v3  ;;  %v1235_v3 = vrot.slane %v1233_v53, 1 }
 0x10e   : > { %v577_v55 = vpop.f32.mrf.mxu1 }
 0x10f   : > { %v822_v9 = vpop.f32.mrf.mxu3  ;;  %v605_v11 = vadd.f32 %v577_v55, %v417_v8  ;;  %v1351_v8 = vrot.slane %v2187_v28, 1  ;;  %v1236_v55 = vsel %vm460_vm2, %v2220_v50, %v1235_v3 }
 0x110   : > { %v852_v58 = vadd.f32 %v822_v9, %v746_v7 }
 0x111   : > { %1723 = vmatmul.msk.bf16.gmra.mxu1 %vm331_vm1, %v2158_v12  ;;  %1731 = vmatmul.msk.bf16.gmra.mxu2 %vm331_vm1, %v2041_v10  ;;  %v946_v18 = vpop.f32.mrf.mxu0  ;;  %v285_v10 = vld [vmem:[#allocation2 + $0x10] sm:$0xff] }
 0x112   : > { %v2294_v13 = vadd.f32 %v943_v4, %v852_v58  ;;  %v419_v6 = vadd.f32 %v2228_v56, %v285_v10  ;;  %v1015_v56 = vsel %vm645_vm3, %v2175_v17, %v2305_v43 }
 0x114   : > { %1739 = vmatmul.msk.bf16.gmra.mxu3 %vm331_vm1, %v2167_v15  ;;  %v719_v19 = vpop.f32.mrf.mxu2  ;;  %1747 = vmatmul.msk.bf16.gmra.mxu0 %vm331_vm1, %v2183_v24 }
 0x115   : > { %v747_v25 = vadd.f32 %v719_v19, %v605_v11  ;;  %v1231_v11 = vunpack.c.l.b16 %v262_v52 }
 0x116   : > { %v579_v26 = vpop.f32.mrf.mxu1 }
 0x117   : > { %v825_v20 = vpop.f32.mrf.mxu3  ;;  %v606_v12 = vadd.f32 %v579_v26, %v418_v33  ;;  %v1232_v19 = vpack.c.b16 %v1231_v11, %v1231_v11 }
 0x118   : > { %v853_v45 = vadd.f32 %v825_v20, %v747_v25  ;;  %v422_v25 = vadd.f32 %v2213_v44, %v288_v61 }
 0x119   : > { %v948_v59 = vpop.f32.mrf.mxu0  ;;  %v1241_v10 = vshll.u32 %v1232_v19, 16 }
 0x11a   : > { %v2301_v29 = vadd.f32 %v946_v18, %v853_v45  ;;  %v1352_v18 = vsel %vm645_vm3, %v2305_v43, %v1351_v8  ;;  %v1237_v45 = vshrl.u32 %v2187_v28, 16 }
 0x11c   : > { %v721_v1 = vpop.f32.mrf.mxu2 }
 0x11d   : > { %v748_v15 = vadd.f32 %v721_v1, %v606_v12  ;;  %v289_v1 = vld [vmem:[#allocation2 + $0x78] sm:$0xff] }
 0x11e   : > { %v582_v36 = vpop.f32.mrf.mxu1  ;;  %v423_v44 = vadd.f32 %v2230_v57, %v289_v1 }
 0x11f   : > { %v827_v32 = vpop.f32.mrf.mxu3  ;;  %v607_v48 = vadd.f32 %v582_v36, %v419_v6  ;;  %v1016_v6 = vrot.slane %v2207_v37, 1  ;;  %v1243_v36 = vrot.slane %v1241_v10, 1 }
 0x120   : > { %v854_v62 = vadd.f32 %v827_v32, %v748_v15  ;;  %v1239_v32 = vor.u32 %v1237_v45, %v1235_v3 }
 0x121   : > { %1724 = vmatmul.msk.bf16.gmra.mxu1 %vm331_vm1, %v2183_v24  ;;  %1732 = vmatmul.msk.bf16.gmra.mxu2 %vm331_vm1, %v2067_v23  ;;  %v951_v41 = vpop.f32.mrf.mxu0 }
 0x122   : > { %v2311_v38 = vadd.f32 %v948_v59, %v854_v62 }
 0x124   : > { %1740 = vmatmul.msk.bf16.gmra.mxu3 %vm331_vm1, %v2196_v31  ;;  %v724_v35 = vpop.f32.mrf.mxu2  ;;  %1748 = vmatmul.msk.bf16.gmra.mxu0 %vm331_vm1, %v1015_v56  ;;  %v287_v31 = vld [vmem:[#allocation2 + $0x60] sm:$0xff] }
 0x125   : > { %v749_v49 = vadd.f32 %v724_v35, %v607_v48  ;;  %v421_v22 = vadd.f32 %v2201_v34, %v287_v31  ;;  %v1353_v35 = vrot.slane %v1232_v19, 1 }
 0x126   : > { %v584_v23 = vpop.f32.mrf.mxu1 }
 0x127   : > { %v830_v24 = vpop.f32.mrf.mxu3  ;;  %v608_v51 = vadd.f32 %v584_v23, %v420_v47  ;;  %v290_v23 = vld [vmem:[#allocation2 + $0x28] sm:$0xff] }
 0x128   : > { %v855_v46 = vadd.f32 %v830_v24, %v749_v49  ;;  %v1244_v24 = vsel %vm460_vm2, %v1239_v32, %v1243_v36 }
 0x129   : > { %v953_v60 = vpop.f32.mrf.mxu0 }
 0x12a   : > { %v2321_v54 = vadd.f32 %v951_v41, %v855_v46  ;;  %v1017_v41 = vsel %vm645_vm3, %v2305_v43, %v1016_v6  ;;  %v424_v43 = vadd.f32 %v2237_v2, %v290_v23 }
 0x12c   : > { %v726_v17 = vpop.f32.mrf.mxu2 }
 0x12d   : > { %v750_v4 = vadd.f32 %v726_v17, %v608_v51  ;;  %v1354_v51 = vsel %vm645_vm3, %v1351_v8, %v1353_v35 }
 0x12e   : > { %v587_v5 = vpop.f32.mrf.mxu1 }
 0x12f   : > { %v832_v63 = vpop.f32.mrf.mxu3  ;;  %v609_v7 = vadd.f32 %v587_v5, %v421_v22 }
 0x130   : > { %v856_v9 = vadd.f32 %v832_v63, %v750_v4 }
 0x131   : > { %1725 = vmatmul.msk.bf16.gmra.mxu1 %vm331_vm1, %v1015_v56  ;;  %1733 = vmatmul.msk.bf16.gmra.mxu2 %vm331_vm1, %v2172_v16  ;;  %v956_v34 = vpop.f32.mrf.mxu0 }
 0x132   : > { %v2331_v58 = vadd.f32 %v953_v60, %v856_v9 }
 0x134   : > { %1741 = vmatmul.msk.bf16.gmra.mxu3 %vm331_vm1, %v1236_v55  ;;  %v729_v33 = vpop.f32.mrf.mxu2  ;;  %1749 = vmatmul.msk.bf16.gmra.mxu0 %vm331_vm1, %v1352_v18 }
 0x135   : > { %v751_v50 = vadd.f32 %v729_v33, %v609_v7 }
 0x136   : > { %v589_v26 = vpop.f32.mrf.mxu1 }
 0x137   : > { %v835_v20 = vpop.f32.mrf.mxu3  ;;  %v610_v12 = vadd.f32 %v589_v26, %v422_v25 }
 0x138   : > { %v857_v16 = vadd.f32 %v835_v20, %v751_v50 }
 0x139   : > { %v958_v15 = vpop.f32.mrf.mxu0 }
 0x13a   : > { %v2339_v59 = vadd.f32 %v956_v34, %v857_v16 }
 0x13c   : > { %v731_v48 = vpop.f32.mrf.mxu2 }
 0x13d   : > { %v752_v62 = vadd.f32 %v731_v48, %v610_v12 }
 0x13e   : > { %v592_v56 = vpop.f32.mrf.mxu1 }
 0x13f   : > { %v837_v39 = vpop.f32.mrf.mxu3  ;;  %v611_v47 = vadd.f32 %v592_v56, %v423_v44 }
 0x140   : > { %v858_v49 = vadd.f32 %v837_v39, %v752_v62 }
 0x141   : > { %1726 = vmatmul.msk.bf16.gmra.mxu1 %vm331_vm1, %v1017_v41  ;;  %1734 = vmatmul.msk.bf16.gmra.mxu2 %vm331_vm1, %v2187_v28  ;;  %v961_v57 = vpop.f32.mrf.mxu0 }
 0x142   : > { %v2349_v37 = vadd.f32 %v958_v15, %v858_v49 }
 0x144   : > { %1742 = vmatmul.msk.bf16.gmra.mxu3 %vm331_vm1, %v1244_v24  ;;  %v734_v46 = vpop.f32.mrf.mxu2  ;;  %1750 = vmatmul.msk.bf16.gmra.mxu0 %vm331_vm1, %v1354_v51 }
 0x145   : > { %v753_v53 = vadd.f32 %v734_v46, %v611_v47 }
 0x146   : > { %v594_v60 = vpop.f32.mrf.mxu1 }
 0x147   : > { %v840_v31 = vpop.f32.mrf.mxu3  ;;  %v612_v3 = vadd.f32 %v594_v60, %v424_v43 }
 0x148   : > { %v859_v17 = vadd.f32 %v840_v31, %v753_v53 }
 0x149   : > { %v963_v28 = vpop.f32.mrf.mxu0 }
 0x14a   : > { %v2355_v52 = vadd.f32 %v961_v57, %v859_v17 }
 0x14c   : > { %v736_v22 = vpop.f32.mrf.mxu2 }
 0x14d   : > { %v754_v4 = vadd.f32 %v736_v22, %v612_v3 }
 0x14e   : > { %v1036_v5 = vpop.f32.mrf.mxu1 }
 0x14f   : > { %v842_v63 = vpop.f32.mrf.mxu3  ;;  %v1076_v2 = vadd.f32 %v1036_v5, %v2247_v27 }
 0x150   : > { %v860_v7 = vadd.f32 %v842_v63, %v754_v4 }
 0x151   : > { %v1373_v8 = vpop.f32.mrf.mxu0 }
 0x152   : > { %v2357_v9 = vadd.f32 %v963_v28, %v860_v7 }
 0x154   : > { %v1142_v55 = vpop.f32.mrf.mxu2 }
 0x155   : > { %v1182_v11 = vadd.f32 %v1142_v55, %v1076_v2 }
 0x156   : > { %v1038_v34 = vpop.f32.mrf.mxu1 }
 0x157   : > { %v1263_v61 = vpop.f32.mrf.mxu3  ;;  %v1077_v25 = vadd.f32 %v1038_v34, %v2253_v40 }
 0x158   : > { %v1303_v18 = vadd.f32 %v1263_v61, %v1182_v11 }
 0x159   : > { %v1375_v33 = vpop.f32.mrf.mxu0 }
 0x15a   : > { %v1413_v19 = vadd.f32 %v1373_v8, %v1303_v18 }
 0x15c   : > { %1429 = vst [vmem:[#allocation2 + $0x30] sm:$0xff] %v1413_v19  ;;  %v1144_v50 = vpop.f32.mrf.mxu2 }
 0x15d   : > { %v1183_v20 = vadd.f32 %v1144_v50, %v1077_v25 }
 0x15e   : > { %v1041_v12 = vpop.f32.mrf.mxu1 }
 0x15f   : > { %v1265_v26 = vpop.f32.mrf.mxu3  ;;  %v1078_v1 = vadd.f32 %v1041_v12, %v2259_v0 }
 0x160   : > { %v1304_v16 = vadd.f32 %v1265_v26, %v1183_v20 }
 0x161   : > { %v1378_v10 = vpop.f32.mrf.mxu0 }
 0x162   : > { %v1414_v45 = vadd.f32 %v1375_v33, %v1304_v16 }
 0x164   : > { %1430 = vst [vmem:[#allocation2] sm:$0xff] %v1414_v45  ;;  %v1147_v27 = vpop.f32.mrf.mxu2 }
 0x165   : > { %v1184_v6 = vadd.f32 %v1147_v27, %v1078_v1 }
 0x166   : > { %v1043_v32 = vpop.f32.mrf.mxu1 }
 0x167   : > { %v1268_v15 = vpop.f32.mrf.mxu3  ;;  %v1079_v40 = vadd.f32 %v1043_v32, %v2266_v14 }
 0x168   : > { %v1305_v36 = vadd.f32 %v1268_v15, %v1184_v6 }
 0x169   : > { %v1380_v44 = vpop.f32.mrf.mxu0 }
 0x16a   : > { %v1415_v48 = vadd.f32 %v1378_v10, %v1305_v36 }
 0x16c   : > { %1431 = vst [vmem:[#allocation2 + $0x58] sm:$0xff] %v1415_v48  ;;  %v1149_v62 = vpop.f32.mrf.mxu2 }
 0x16d   : > { %v1185_v39 = vadd.f32 %v1149_v62, %v1079_v40 }
 0x16e   : > { %v1046_v41 = vpop.f32.mrf.mxu1 }
 0x16f   : > { %v1270_v56 = vpop.f32.mrf.mxu3  ;;  %v1080_v0 = vadd.f32 %v1046_v41, %v2273_v30 }
 0x170   : > { %v1306_v35 = vadd.f32 %v1270_v56, %v1185_v39 }
 0x171   : > { %v1383_v49 = vpop.f32.mrf.mxu0 }
 0x172   : > { %v1416_v47 = vadd.f32 %v1380_v44, %v1306_v35 }
 0x174   : > { %1432 = vst [vmem:[#allocation2 + $0x18] sm:$0xff] %v1416_v47  ;;  %v1152_v24 = vpop.f32.mrf.mxu2 }
 0x175   : > { %v1186_v23 = vadd.f32 %v1152_v24, %v1080_v0 }
 0x176   : > { %v1048_v51 = vpop.f32.mrf.mxu1 }
 0x177   : > { %v1273_v57 = vpop.f32.mrf.mxu3  ;;  %v1081_v14 = vadd.f32 %v1048_v51, %v2280_v42 }
 0x178   : > { %v1307_v46 = vadd.f32 %v1273_v57, %v1186_v23 }
 0x179   : > { %v1385_v53 = vpop.f32.mrf.mxu0 }
 0x17a   : > { %v1417_v43 = vadd.f32 %v1383_v49, %v1307_v46 }
 0x17c   : > { %1433 = vst [vmem:[#allocation2 + $0x50] sm:$0xff] %v1417_v43  ;;  %v1154_v31 = vpop.f32.mrf.mxu2 }
 0x17d   : > { %v1187_v60 = vadd.f32 %v1154_v31, %v1081_v14 }
 0x17e   : > { %v1051_v17 = vpop.f32.mrf.mxu1 }
 0x17f   : > { %v1275_v3 = vpop.f32.mrf.mxu3  ;;  %v1082_v30 = vadd.f32 %v1051_v17, %v2287_v21 }
 0x180   : > { %v1308_v28 = vadd.f32 %v1275_v3, %v1187_v60 }
 0x181   : > { %v1388_v4 = vpop.f32.mrf.mxu0 }
 0x182   : > { %v1418_v22 = vadd.f32 %v1385_v53, %v1308_v28 }
 0x184   : > { %1434 = vst [vmem:[#allocation2 + $0x68] sm:$0xff] %v1418_v22  ;;  %v1157_v63 = vpop.f32.mrf.mxu2 }
 0x185   : > { %v1188_v5 = vadd.f32 %v1157_v63, %v1082_v30 }
 0x186   : > { %v1053_v8 = vpop.f32.mrf.mxu1 }
 0x187   : > { %v1278_v7 = vpop.f32.mrf.mxu3  ;;  %v1083_v42 = vadd.f32 %v1053_v8, %v2294_v13 }
 0x188   : > { %v1309_v2 = vadd.f32 %v1278_v7, %v1188_v5 }
 0x189   : > { %v1390_v11 = vpop.f32.mrf.mxu0 }
 0x18a   : > { %v1419_v55 = vadd.f32 %v1388_v4, %v1309_v2 }
 0x18c   : > { %1435 = vst [vmem:[#allocation2 + $0x8] sm:$0xff] %v1419_v55  ;;  %v1159_v61 = vpop.f32.mrf.mxu2 }
 0x18d   : > { %v1189_v34 = vadd.f32 %v1159_v61, %v1083_v42 }
 0x18e   : > { %v1056_v19 = vpop.f32.mrf.mxu1 }
 0x18f   : > { %v1280_v18 = vpop.f32.mrf.mxu3  ;;  %v1084_v21 = vadd.f32 %v1056_v19, %v2301_v29 }
 0x190   : > { %v1310_v33 = vadd.f32 %v1280_v18, %v1189_v34 }
 0x191   : > { %v1393_v50 = vpop.f32.mrf.mxu0 }
 0x192   : > { %v1420_v25 = vadd.f32 %v1390_v11, %v1310_v33 }
 0x194   : > { %1436 = vst [vmem:[#allocation2 + $0x48] sm:$0xff] %v1420_v25  ;;  %v1162_v20 = vpop.f32.mrf.mxu2 }
 0x195   : > { %v1190_v26 = vadd.f32 %v1162_v20, %v1084_v21 }
 0x196   : > { %v1058_v16 = vpop.f32.mrf.mxu1 }
 0x197   : > { %v1283_v12 = vpop.f32.mrf.mxu3  ;;  %v1085_v13 = vadd.f32 %v1058_v16, %v2311_v38 }
 0x198   : > { %v1311_v45 = vadd.f32 %v1283_v12, %v1190_v26 }
 0x199   : > { %v1395_v1 = vpop.f32.mrf.mxu0 }
 0x19a   : > { %v1421_v10 = vadd.f32 %v1393_v50, %v1311_v45 }
 0x19c   : > { %1437 = vst [vmem:[#allocation2 + $0x40] sm:$0xff] %v1421_v10  ;;  %v1164_v27 = vpop.f32.mrf.mxu2 }
 0x19d   : > { %v1191_v6 = vadd.f32 %v1164_v27, %v1085_v13 }
 0x19e   : > { %v1061_v32 = vpop.f32.mrf.mxu1 }
 0x19f   : > { %v1285_v15 = vpop.f32.mrf.mxu3  ;;  %v1086_v29 = vadd.f32 %v1061_v32, %v2321_v54 }
 0x1a0   : > { %v1312_v36 = vadd.f32 %v1285_v15, %v1191_v6 }
 0x1a1   : > { %v1398_v44 = vpop.f32.mrf.mxu0 }
 0x1a2   : > { %v1422_v48 = vadd.f32 %v1395_v1, %v1312_v36 }
 0x1a4   : > { %1438 = vst [vmem:[#allocation2 + $0x20] sm:$0xff] %v1422_v48  ;;  %v1167_v40 = vpop.f32.mrf.mxu2 }
 0x1a5   : > { %v1192_v62 = vadd.f32 %v1167_v40, %v1086_v29 }
 0x1a6   : > { %v1063_v56 = vpop.f32.mrf.mxu1 }
 0x1a7   : > { %v1288_v39 = vpop.f32.mrf.mxu3  ;;  %v1087_v38 = vadd.f32 %v1063_v56, %v2331_v58 }
 0x1a8   : > { %v1313_v41 = vadd.f32 %v1288_v39, %v1192_v62 }
 0x1a9   : > { %v1400_v47 = vpop.f32.mrf.mxu0 }
 0x1aa   : > { %v1423_v35 = vadd.f32 %v1398_v44, %v1313_v41 }
 0x1ac   : > { %1439 = vst [vmem:[#allocation2 + $0x10] sm:$0xff] %v1423_v35  ;;  %v1169_v49 = vpop.f32.mrf.mxu2 }
 0x1ad   : > { %v1193_v0 = vadd.f32 %v1169_v49, %v1087_v38 }
 0x1ae   : > { %v1066_v23 = vpop.f32.mrf.mxu1 }
 0x1af   : > { %v1290_v24 = vpop.f32.mrf.mxu3  ;;  %v1088_v54 = vadd.f32 %v1066_v23, %v2339_v59 }
 0x1b0   : > { %v1314_v57 = vadd.f32 %v1290_v24, %v1193_v0 }
 0x1b1   : > { %v1403_v46 = vpop.f32.mrf.mxu0 }
 0x1b2   : > { %v1424_v51 = vadd.f32 %v1400_v47, %v1314_v57 }
 0x1b4   : > { %1440 = vst [vmem:[#allocation2 + $0x38] sm:$0xff] %v1424_v51  ;;  %v1172_v43 = vpop.f32.mrf.mxu2 }
 0x1b5   : > { %v1194_v53 = vadd.f32 %v1172_v43, %v1088_v54 }
 0x1b6   : > { %v1068_v31 = vpop.f32.mrf.mxu1 }
 0x1b7   : > { %v1293_v14 = vpop.f32.mrf.mxu3  ;;  %v1089_v17 = vadd.f32 %v1068_v31, %v2349_v37 }
 0x1b8   : > { %v1315_v60 = vadd.f32 %v1293_v14, %v1194_v53 }
 0x1b9   : > { %v1405_v28 = vpop.f32.mrf.mxu0 }
 0x1ba   : > { %v1425_v3 = vadd.f32 %v1403_v46, %v1315_v60 }
 0x1bc   : > { %1441 = vst [vmem:[#allocation2 + $0x60] sm:$0xff] %v1425_v3  ;;  %v1174_v58 = vpop.f32.mrf.mxu2 }
 0x1bd   : > { %v1195_v22 = vadd.f32 %v1174_v58, %v1089_v17 }
 0x1be   : > { %v1071_v30 = vpop.f32.mrf.mxu1 }
 0x1bf   : > { %v1295_v4 = vpop.f32.mrf.mxu3  ;;  %v1090_v7 = vadd.f32 %v1071_v30, %v2355_v52 }
 0x1c0   : > { %v1316_v63 = vadd.f32 %v1295_v4, %v1195_v22 }
 0x1c1   : > { %v1408_v55 = vpop.f32.mrf.mxu0 }
 0x1c2   : > { %v1426_v5 = vadd.f32 %v1405_v28, %v1316_v63 }
 0x1c4   : > { %1442 = vst [vmem:[#allocation2 + $0x70] sm:$0xff] %v1426_v5  ;;  %v1177_v59 = vpop.f32.mrf.mxu2 }
 0x1c5   : > { %v1196_v8 = vadd.f32 %v1177_v59, %v1090_v7 }
 0x1c6   : > { %v1073_v42 = vpop.f32.mrf.mxu1 }
 0x1c7   : > { %v1298_v2 = vpop.f32.mrf.mxu3  ;;  %v1091_v37 = vadd.f32 %v1073_v42, %v2357_v9 }
 0x1c8   : > { %v1317_v11 = vadd.f32 %v1298_v2, %v1196_v8 }
 0x1c9   : > { %v1410_v25 = vpop.f32.mrf.mxu0 }
 0x1ca   : > { %v1427_v61 = vadd.f32 %v1408_v55, %v1317_v11 }
 0x1cc   : > { %1443 = vst [vmem:[#allocation2 + $0x78] sm:$0xff] %v1427_v61  ;;  %v1179_v34 = vpop.f32.mrf.mxu2 }
 0x1cd   : > { %v1197_v18 = vadd.f32 %v1179_v34, %v1091_v37 }
 0x1cf   : > { %v1300_v19 = vpop.f32.mrf.mxu3 }
 0x1d0   : > { %v1318_v33 = vadd.f32 %v1300_v19, %v1197_v18  ;;  %1448 = sbr.rel (%p1751_p10) target bundleno = 485 (0x1e5), region = 40 }
 0x1d2   : > { %v1428_v50 = vadd.f32 %v1410_v25, %v1318_v33 }
 0x1d4   : > { %1444 = vst [vmem:[#allocation2 + $0x28] sm:$0xff] %v1428_v50 }
 0x1d5   : > { %v1449_v52 = vld [vmem:[#allocation2 + $0x30] sm:$0xff]  ;;  %v1450_v21 = vld [vmem:[#allocation2] sm:$0xff]  ;;  %v1451_v26 = vld [vmem:[#allocation2 + $0x58] sm:$0xff] }
 0x1d6   : > { %v1882_v20 = vld [vmem:[%s2410_s2] ss:$0 sm:$0xff]  ;;  %v1452_v12 = vld [vmem:[#allocation2 + $0x18] sm:$0xff]  ;;  %v1453_v9 = vld [vmem:[#allocation2 + $0x50] sm:$0xff] }
 0x1d7   : > { %v1454_v16 = vld [vmem:[#allocation2 + $0x68] sm:$0xff]  ;;  %v1469_v10 = vadd.f32 %v1882_v20, %v1449_v52  ;;  %v1470_v1 = vadd.f32 %v1882_v20, %v1450_v21  ;;  %v1471_v13 = vadd.f32 %v1882_v20, %v1451_v26  ;;  %v1472_v27 = vadd.f32 %v1882_v20, %v1452_v12  ;;  %v1457_v44 = vld [vmem:[#allocation2 + $0x40] sm:$0xff]  ;;  %v1459_v41 = vld [vmem:[#allocation2 + $0x10] sm:$0xff] }
 0x1d8   : > { %v1455_v45 = vld [vmem:[#allocation2 + $0x8] sm:$0xff]  ;;  %v1473_v15 = vadd.f32 %v1882_v20, %v1453_v9  ;;  %v1474_v32 = vadd.f32 %v1882_v20, %v1454_v16  ;;  %v1458_v29 = vld [vmem:[#allocation2 + $0x20] sm:$0xff]  ;;  %v1460_v35 = vld [vmem:[#allocation2 + $0x38] sm:$0xff]  ;;  %v1477_v46 = vadd.f32 %v1882_v20, %v1457_v44  ;;  %v1479_v60 = vadd.f32 %v1882_v20, %v1459_v41 }
 0x1d9   : > { %v1456_v6 = vld [vmem:[#allocation2 + $0x48] sm:$0xff]  ;;  %v1475_v36 = vadd.f32 %v1882_v20, %v1455_v45  ;;  %v1485_v40 = vmax.f32 %v1469_v10, 0.0  ;;  %v1486_v62 = vmax.f32 %v1470_v1, 0.0  ;;  %v1487_v39 = vmax.f32 %v1471_v13, 0.0  ;;  %v1461_v24 = vld [vmem:[#allocation2 + $0x60] sm:$0xff]  ;;  %v1462_v23 = vld [vmem:[#allocation2 + $0x70] sm:$0xff] }
 0x1da   : > { %v1476_v48 = vadd.f32 %v1882_v20, %v1456_v6  ;;  %v1488_v56 = vmax.f32 %v1472_v27, 0.0  ;;  %v1489_v47 = vmax.f32 %v1473_v15, 0.0  ;;  %v1490_v38 = vmax.f32 %v1474_v32, 0.0  ;;  %v1463_v43 = vld [vmem:[#allocation2 + $0x78] sm:$0xff] }
 0x1db   : > { %v1491_v49 = vmax.f32 %v1475_v36, 0.0  ;;  %v1774_v57 = vpack.c.bf16 %v1486_v62, %v1485_v40  ;;  %v1478_v54 = vadd.f32 %v1882_v20, %v1458_v29  ;;  %v1464_v53 = vld [vmem:[#allocation2 + $0x28] sm:$0xff]  ;;  %v1480_v3 = vadd.f32 %v1882_v20, %v1460_v35 }
 0x1dc   : > { %v1492_v0 = vmax.f32 %v1476_v48, 0.0  ;;  %v1779_v51 = vpack.c.bf16 %v1488_v56, %v1487_v39  ;;  %v1784_v14 = vpack.c.bf16 %v1490_v38, %v1489_v47  ;;  %v1493_v17 = vmax.f32 %v1477_v46, 0.0 }
 0x1dd   : > { %1775 = vst [vmem:[%s2018_s9] sm:$0xff] %v1774_v57   ;;  %v1494_v58 = vmax.f32 %v1478_v54, 0.0  ;;  %v1481_v28 = vadd.f32 %v1882_v20, %v1461_v24  ;;  %v1482_v22 = vadd.f32 %v1882_v20, %v1462_v23  ;;  %v1495_v4 = vmax.f32 %v1479_v60, 0.0 }
 0x1de   : > { %v1789_v31 = vpack.c.bf16 %v1492_v0, %v1491_v49  ;;  %1813 = vst [vmem:[%s2018_s9 + $0x8] sm:$0xff] %v1779_v51   ;;  %v1496_v30 = vmax.f32 %v1480_v3, 0.0  ;;  %v1483_v63 = vadd.f32 %v1882_v20, %v1463_v43  ;;  %v1484_v5 = vadd.f32 %v1882_v20, %v1464_v53 }
 0x1df   : > { %1814 = vst [vmem:[%s2018_s9 + $0x10] sm:$0xff] %v1784_v14   ;;  %v1794_v7 = vpack.c.bf16 %v1494_v58, %v1493_v17  ;;  %v1497_v59 = vmax.f32 %v1481_v28, 0.0  ;;  %v1498_v8 = vmax.f32 %v1482_v22, 0.0 }
 0x1e0   : > { %1815 = vst [vmem:[%s2018_s9 + $0x18] sm:$0xff] %v1789_v31   ;;  %v1799_v2 = vpack.c.bf16 %v1496_v30, %v1495_v4  ;;  %v1499_v55 = vmax.f32 %v1483_v63, 0.0  ;;  %v1500_v11 = vmax.f32 %v1484_v5, 0.0 }
 0x1e1   : > { %1816 = vst [vmem:[%s2018_s9 + $0x20] sm:$0xff] %v1794_v7   ;;  %v1804_v42 = vpack.c.bf16 %v1498_v8, %v1497_v59 }
 0x1e2   : > { %1817 = vst [vmem:[%s2018_s9 + $0x28] sm:$0xff] %v1799_v2   ;;  %v1809_v61 = vpack.c.bf16 %v1500_v11, %v1499_v55 }
 0x1e3   : > { %1818 = vst [vmem:[%s2018_s9 + $0x30] sm:$0xff] %v1804_v42  }
 0x1e4   : > { %1819 = vst [vmem:[%s2018_s9 + $0x38] sm:$0xff] %v1809_v61  }
 0x1e5 PF: > { %s13_s18 = sadd.s32 1, %s1937_s18   ;;  %s2412_s12 = smov %s1925_s15 }
 0x1e6   : > { %p10_p11 = scmp.ge.s32.totalorder %s13_s18, 50   ;;  %s2413_s13 = smov %s1929_s16 }
 0x1e7   : > { %s2414_s14 = smov %s1933_s17  ;;  %s2415_s15 = smov %s2419_s19 }
 0x1e8   : > { %s2416_s16 = smov %s2423_s20  ;;  %s2417_s17 = smov %s2427_s21 }
 0x1e9   :  { %12 = sbr.rel (!%p10_p11) target bundleno = 4 (0x4), region = 71 }

// kernel: _lambda_.3
= control target key start
LH: loop header
LB: loop body
LE: loop exit
PB: predicated region body
PF: predicated region fallthrough
CT: control target
= control target key end

     0   :  { %s2364_s12 = smov 0   ;;  %s2366_s13 = smov 0   ;;  %s2802_s0 = inlined_call_operand.vmem [shape: bf16[2,10,176,128], index: 0, kind: input, shape index: {}]   ;;  %s2803_s1 = inlined_call_operand.vmem [shape: bf16[3,1152,128], index: 1, kind: input, shape index: {}]   ;;  %s2804_s2 = inlined_call_operand.vmem [shape: f32[1,128], index: 2, kind: input, shape index: {}]   ;;  %s2805_s3 = inlined_call_operand.vmem [shape: bf16[2,8,128,128], index: 3, kind: output, shape index: {}]  }
   0x1   :  { %s2368_s14 = smov 0   ;;  %s2370_s15 = smov 0  }
   0x2   :  { %s2372_s16 = smov 0   ;;  %s2374_s17 = smov 0  }
   0x3   :  { %s2376_s18 = smov 0  }
   0x4 LB: > { %s25_s19 = sadd.s32 1, %s2329_s15  ;;  %s28_s20 = sadd.s32 1, %s2333_s16  ;;  %s2341_s18 = sphi %s2376_s18, %s13_s18   ;;  %s2337_s17 = sphi %s2374_s17, %s2811_s17   ;;  %s2333_s16 = sphi %s2372_s16, %s2810_s16   ;;  %s2329_s15 = sphi %s2370_s15, %s2809_s15   ;;  %s2325_s14 = sphi %s2368_s14, %s2808_s14   ;;  %s2321_s13 = sphi %s2366_s13, %s2807_s13   ;;  %s2317_s12 = sphi %s2364_s12, %s2806_s12  }
   0x5   : > { %p26_p0 = scmp.ge.s32.totalorder %s25_s19, 3  ;;  %p1735_p1 = scmp.ge.s32.totalorder %s2341_s18, 1 }
   0x6   : > { %p168_p2 = scmp.lt.s32.totalorder %s2341_s18, 49  ;;  %s32_s21 = sadd.s32 1, %s2337_s17 }
   0x7   : > { %s2813_s19 = smov (%p26_p0, %s25_s19), 0  ;;  %s2815_s20 = smov (!%p26_p0, %s28_s20), %s2333_s16 }
   0x8   : > { %p169_p3 = pnand %p1735_p1, %p168_p2  ;;  %p30_p4 = scmp.ge.s32.totalorder %s2815_s20, 8 }
   0x9   : > { %s201_s22 = sadd.s32 (!%p169_p3), %s2317_s12, %s2321_s13  ;;  %p202_p6 = scmp.lt.s32.totalorder (!%p169_p3), %s2325_s14, 1 }
   0xa   : > { %s2817_s20 = smov (%p30_p4, %s2815_s20), 0  ;;  %s2819_s21 = smov (!%p30_p4, %s32_s21), %s2337_s17 }
   0xb   : > { %p34_p5 = scmp.ge.s32.totalorder %s2819_s21, 2  ;;  %172 = sbr.rel (%p169_p3) target bundleno = 513 (0x201), region = 32 }
   0xc   : > { %p204_p7 = scmp.lt.s32.totalorder (!%p169_p3), %s201_s22, 9  ;;  %p214_p8 = scmp.lt.s32.totalorder (!%p169_p3), %s2321_s13, 7 }
   0xd   : > { %s2821_s21 = smov (%p34_p5, %s2819_s21), 0  ;;  %p1740_p9 = scmp.ne.s32.totalorder (!%p169_p3), %s2317_s12, 0 }
  0x10   : > { %s2823_s14 = smov (!%p202_p6, %s2325_s14), 1  ;;  %s2825_s22 = smov (!%p204_p7, %s201_s22), 9 }
  0x11   : > { %s2228_s23 = smul.u32 220, %s2823_s14  ;;  %s1738_s25 = sshll.u32 %s2823_s14, 7 }
  0x12   : > { %s2227_s24 = smul.u32 22, %s2825_s22  ;;  %s2827_s13 = smov (!%p214_p8, %s2321_s13), 7 }
  0x13   : > { %s1737_s28 = sshll.u32 %s2827_s13, 4  ;;  %224 = sbr.rel (%p1740_p9) target bundleno = 41 (0x29), region = 36 }
  0x14   : > { %s208_s26 = sadd.s32 %s2228_s23, %s2227_s24  ;;  %s218_s5 = sadd.s32 %s1738_s25, %s1737_s28 }
  0x15   : > { %s1736_s27 = sshll.u32 %s208_s26, 2  ;;  %s1739_s6 = sshll.u32 %s218_s5, 2 }
  0x16   : > { %s2417_s4 = scalar_lea.vmem %s2802_s0, %s1736_s27  ;;  %s2422_s9 = scalar_lea.vmem %s2805_s3, %s1739_s6 }
  0x18   : > { %v2343_v0 = vmov 0.0  }
  0x19   : > { %225 = vst [vmem:[#allocation2 + $0x30] sm:$0xff] %v2343_v0 }
  0x1a   : > { %226 = vst [vmem:[#allocation2] sm:$0xff] %v2343_v0 }
  0x1b   : > { %227 = vst [vmem:[#allocation2 + $0x58] sm:$0xff] %v2343_v0 }
  0x1c   : > { %228 = vst [vmem:[#allocation2 + $0x18] sm:$0xff] %v2343_v0 }
  0x1d   : > { %229 = vst [vmem:[#allocation2 + $0x50] sm:$0xff] %v2343_v0 }
  0x1e   : > { %230 = vst [vmem:[#allocation2 + $0x68] sm:$0xff] %v2343_v0 }
  0x1f   : > { %231 = vst [vmem:[#allocation2 + $0x8] sm:$0xff] %v2343_v0 }
  0x20   : > { %232 = vst [vmem:[#allocation2 + $0x48] sm:$0xff] %v2343_v0 }
  0x21   : > { %233 = vst [vmem:[#allocation2 + $0x40] sm:$0xff] %v2343_v0 }
  0x22   : > { %234 = vst [vmem:[#allocation2 + $0x20] sm:$0xff] %v2343_v0 }
  0x23   : > { %235 = vst [vmem:[#allocation2 + $0x10] sm:$0xff] %v2343_v0 }
  0x24   : > { %236 = vst [vmem:[#allocation2 + $0x38] sm:$0xff] %v2343_v0 }
  0x25   : > { %237 = vst [vmem:[#allocation2 + $0x60] sm:$0xff] %v2343_v0 }
  0x26   : > { %238 = vst [vmem:[#allocation2 + $0x70] sm:$0xff] %v2343_v0 }
  0x27   : > { %239 = vst [vmem:[#allocation2 + $0x78] sm:$0xff] %v2343_v0 }
  0x28   : > { %240 = vst [vmem:[#allocation2 + $0x28] sm:$0xff] %v2343_v0 }
  0x29 PF: > { %s2073_s10 = smul.u32 576, %s2317_s12  ;;  %v2442_v11 = vld [vmem:[%s2417_s4 + $0x10] sm:$0xff]  ;;  %v2445_v12 = vld [vmem:[%s2417_s4 + $0x20] sm:$0xff]  ;;  %v2474_v31 = vld [vmem:[%s2417_s4 + $0x18] sm:$0xff]  ;;  %vm460_vm0 = vsmask.f32 7424 }
  0x2a   : > { %v2448_v13 = vld [vmem:[%s2417_s4 + $0x30] sm:$0xff]  ;;  %v2451_v14 = vld [vmem:[%s2417_s4] sm:$0xff]  ;;  %v2477_v32 = vld [vmem:[%s2417_s4 + $0x28] sm:$0xff]  ;;  %v477_v51 = vshll.u32 %v2442_v11, 16  ;;  %vm537_vm1 = vcmask 1046528   ;;  %p2062_p10 = scmp.ne.s32.totalorder %s2317_s12, 2 }
  0x2b   : > { %s2429_s14 = scalar_lea.vmem %s2803_s1, %s2073_s10  ;;  %v2480_v33 = vld [vmem:[%s2417_s4 + $0x38] sm:$0xff]  ;;  %v2483_v34 = vld [vmem:[%s2417_s4 + $0x8] sm:$0xff]  ;;  %v464_v39 = vshll.u32 %v2451_v14, 16  ;;  %v462_v45 = vshrl.u32 %v2451_v14, 16  ;;  %v538_v57 = vrot.slane %v2451_v14, 1 }
  0x2c   : > { %v2081_v1 = vld [vmem:[%s2429_s14 + $0x38] sm:$0xff]  ;;  %v2080_v2 = vld [vmem:[%s2429_s14 + $0x30] sm:$0xff]  ;;  %v2079_v3 = vld [vmem:[%s2429_s14 + $0x28] sm:$0xff]  ;;  %v469_v42 = vshll.u32 %v2483_v34, 16  ;;  %v473_v50 = vshrl.u32 %v2483_v34, 16  ;;  %v539_v58 = vrot.slane %v2483_v34, 1 }
  0x2d   : > { %2203 = vmatpush.bf16.msra.mxu1 %v2081_v1  ;;  %2204 = vmatpush.bf16.msra.mxu2 %v2081_v1  ;;  %v2078_v4 = vld [vmem:[%s2429_s14 + $0x20] sm:$0xff]  ;;  %v2077_v5 = vld [vmem:[%s2429_s14 + $0x18] sm:$0xff]  ;;  %v2076_v6 = vld [vmem:[%s2429_s14 + $0x10] sm:$0xff]  ;;  %v466_v46 = vrot.slane %v464_v39, 1  ;;  %v479_v62 = vrot.slane %v477_v51, 1  ;;  %v505_v51 = vshrl.u32 %v2477_v32, 16 }
  0x2e   : > { %2205 = vmatpush.bf16.msra.mxu3 %v2081_v1  ;;  %1067 = vmatpush.bf16.msra.mxu0 %v2081_v1  ;;  %v2075_v7 = vld [vmem:[%s2429_s14 + $0x8] sm:$0xff]  ;;  %v2074_v8 = vld [vmem:[%s2429_s14] sm:$0xff]  ;;  %v2097_v9 = vld [vmem:[%s2429_s14 + $0xb8] sm:$0xff]  ;;  %v471_v49 = vrot.slane %v469_v42, 1  ;;  %v545_v42 = vrot.slane %v2445_v12, 1 }
  0x2f   : > { %v2089_v10 = vld [vmem:[%s2429_s14 + $0x78] sm:$0xff]  ;;  %v2096_v17 = vld [vmem:[%s2429_s14 + $0xb0] sm:$0xff]  ;;  %v2095_v21 = vld [vmem:[%s2429_s14 + $0xa8] sm:$0xff]  ;;  %v467_v56 = vor.u32 %v466_v46, %v462_v45 }
  0x30   : > { %v2105_v15 = vld [vmem:[%s2429_s14 + $0xf8] sm:$0xff]  ;;  %v2088_v18 = vld [vmem:[%s2429_s14 + $0x70] sm:$0xff]  ;;  %v2087_v22 = vld [vmem:[%s2429_s14 + $0x68] sm:$0xff]  ;;  %v475_v61 = vor.u32 %v473_v50, %v471_v49 }
  0x31   : > { %2206 = vmatpush.bf16.msra.mxu1 %v2080_v2  ;;  %2207 = vmatpush.bf16.msra.mxu2 %v2080_v2  ;;  %v2113_v16 = vld [vmem:[%s2429_s14 + $0x138] sm:$0xff]  ;;  %v2104_v19 = vld [vmem:[%s2429_s14 + $0xf0] sm:$0xff]  ;;  %v2103_v23 = vld [vmem:[%s2429_s14 + $0xe8] sm:$0xff]  ;;  %v472_v1 = vsel %vm460_vm0, %v467_v56, %v471_v49 }
  0x32   : > { %2208 = vmatpush.bf16.msra.mxu3 %v2080_v2  ;;  %1068 = vmatpush.bf16.msra.mxu0 %v2080_v2  ;;  %v2112_v20 = vld [vmem:[%s2429_s14 + $0x130] sm:$0xff]  ;;  %v2111_v24 = vld [vmem:[%s2429_s14 + $0x128] sm:$0xff]  ;;  %v2094_v25 = vld [vmem:[%s2429_s14 + $0xa0] sm:$0xff]  ;;  %v540_v2 = vsel %vm537_vm1, %v538_v57, %v539_v58 }
  0x33   : > { %v2086_v26 = vld [vmem:[%s2429_s14 + $0x60] sm:$0xff]  ;;  %v2093_v29 = vld [vmem:[%s2429_s14 + $0x98] sm:$0xff]  ;;  %v2092_v37 = vld [vmem:[%s2429_s14 + $0x90] sm:$0xff] }
  0x34   : > { %v2102_v27 = vld [vmem:[%s2429_s14 + $0xe0] sm:$0xff]  ;;  %v2085_v30 = vld [vmem:[%s2429_s14 + $0x58] sm:$0xff]  ;;  %v2084_v38 = vld [vmem:[%s2429_s14 + $0x50] sm:$0xff] }
  0x35   : > { %2209 = vmatpush.bf16.msra.mxu1 %v2079_v3  ;;  %2210 = vmatpush.bf16.msra.mxu2 %v2079_v3  ;;  %v2110_v28 = vld [vmem:[%s2429_s14 + $0x120] sm:$0xff]  ;;  %v2101_v35 = vld [vmem:[%s2429_s14 + $0xd8] sm:$0xff]  ;;  %v2100_v40 = vld [vmem:[%s2429_s14 + $0xd0] sm:$0xff] }
  0x36   : > { %2211 = vmatpush.bf16.msra.mxu3 %v2079_v3  ;;  %1069 = vmatpush.bf16.msra.mxu0 %v2079_v3  ;;  %v2109_v36 = vld [vmem:[%s2429_s14 + $0x118] sm:$0xff]  ;;  %v2108_v41 = vld [vmem:[%s2429_s14 + $0x110] sm:$0xff]  ;;  %v2091_v43 = vld [vmem:[%s2429_s14 + $0x88] sm:$0xff]  ;;  %v480_v3 = vsel %vm460_vm0, %v475_v61, %v479_v62  ;;  %v513_v61 = vshrl.u32 %v2448_v13, 16 }
  0x37   : > { %v2083_v44 = vld [vmem:[%s2429_s14 + $0x48] sm:$0xff]  ;;  %v2090_v52 = vld [vmem:[%s2429_s14 + $0x80] sm:$0xff]  ;;  %v2129_v54 = vld [vmem:[%s2429_s14 + $0x1b8] sm:$0xff] }
  0x38   : > { %v2099_v47 = vld [vmem:[%s2429_s14 + $0xc8] sm:$0xff]  ;;  %v2082_v53 = vld [vmem:[%s2429_s14 + $0x40] sm:$0xff]  ;;  %v2121_v55 = vld [vmem:[%s2429_s14 + $0x178] sm:$0xff] }
  0x39   : > { %2212 = vmatpush.bf16.msra.mxu1 %v2078_v4  ;;  %2213 = vmatpush.bf16.msra.mxu2 %v2078_v4  ;;  %v2107_v48 = vld [vmem:[%s2429_s14 + $0x108] sm:$0xff]  ;;  %v2098_v59 = vld [vmem:[%s2429_s14 + $0xc0] sm:$0xff]  ;;  %v2137_v63 = vld [vmem:[%s2429_s14 + $0x1f8] sm:$0xff] }
  0x3a   : > { %2214 = vmatpush.bf16.msra.mxu3 %v2078_v4  ;;  %1070 = vmatpush.bf16.msra.mxu0 %v2078_v4  ;;  %v2106_v60 = vld [vmem:[%s2429_s14 + $0x100] sm:$0xff]  ;;  %v2145_v0 = vld [vmem:[%s2429_s14 + $0x238] sm:$0xff]  ;;  %v2128_v4 = vld [vmem:[%s2429_s14 + $0x1b0] sm:$0xff] }
  0x3b   : > { %v2141_v39 = vld [vmem:[%s2429_s14 + $0x218] sm:$0xff]  ;;  %v2116_v49 = vld [vmem:[%s2429_s14 + $0x150] sm:$0xff] }
  0x3c   : > { %v2140_v50 = vld [vmem:[%s2429_s14 + $0x210] sm:$0xff] }
  0x3d   : > { %2215 = vmatpush.bf16.msra.mxu1 %v2077_v5  ;;  %2216 = vmatpush.bf16.msra.mxu2 %v2077_v5 }
  0x3e   : > { %2217 = vmatpush.bf16.msra.mxu3 %v2077_v5  ;;  %1071 = vmatpush.bf16.msra.mxu0 %v2077_v5  ;;  %v2120_v5 = vld [vmem:[%s2429_s14 + $0x170] sm:$0xff] }
  0x41   : > { %2218 = vmatpush.bf16.msra.mxu1 %v2076_v6  ;;  %2219 = vmatpush.bf16.msra.mxu2 %v2076_v6 }
  0x42   : > { %2220 = vmatpush.bf16.msra.mxu3 %v2076_v6  ;;  %1072 = vmatpush.bf16.msra.mxu0 %v2076_v6  ;;  %v2136_v6 = vld [vmem:[%s2429_s14 + $0x1f0] sm:$0xff] }
  0x45   : > { %2221 = vmatpush.bf16.msra.mxu1 %v2075_v7  ;;  %2222 = vmatpush.bf16.msra.mxu2 %v2075_v7 }
  0x46   : > { %2223 = vmatpush.bf16.msra.mxu3 %v2075_v7  ;;  %1073 = vmatpush.bf16.msra.mxu0 %v2075_v7  ;;  %v2144_v7 = vld [vmem:[%s2429_s14 + $0x230] sm:$0xff] }
  0x49   : > { %2224 = vmatpush.bf16.msra.mxu1 %v2074_v8  ;;  %2225 = vmatpush.bf16.msra.mxu2 %v2074_v8 }
  0x4a   : > { %2226 = vmatpush.bf16.msra.mxu3 %v2074_v8  ;;  %1074 = vmatpush.bf16.msra.mxu0 %v2074_v8  ;;  %v2127_v8 = vld [vmem:[%s2429_s14 + $0x1a8] sm:$0xff] }
  0x4c   : > { %1085 = vmatmul.bf16.vlgmr.msra.gmra.mxu1 %v2442_v11  ;;  %1095 = vmatmul.bf16.vlgmr.msra.gmra.mxu2 %v2445_v12 }
  0x4d   : > { %1165 = vmatpush.bf16.msrb.mxu2 %v2097_v9  ;;  %1116 = vmatpush.bf16.msrb.mxu1 %v2089_v10  ;;  %v2119_v9 = vld [vmem:[%s2429_s14 + $0x168] sm:$0xff] }
  0x4e   : > { %1105 = vmatmul.bf16.vlgmr.msra.gmra.mxu3 %v2448_v13  ;;  %1075 = vmatmul.bf16.vlgmr.msra.gmra.mxu0 %v2451_v14  ;;  %v2135_v10 = vld [vmem:[%s2429_s14 + $0x1e8] sm:$0xff] }
  0x4f   : > { %1214 = vmatpush.bf16.msrb.mxu3 %v2105_v15  ;;  %1263 = vmatpush.bf16.msrb.mxu0 %v2113_v16  ;;  %v2143_v14 = vld [vmem:[%s2429_s14 + $0x228] sm:$0xff]  ;;  %v481_v15 = vshrl.u32 %v2442_v11, 16  ;;  %v485_v16 = vshll.u32 %v2474_v31, 16 }
  0x51   : > { %1166 = vmatpush.bf16.msrb.mxu2 %v2096_v17  ;;  %1117 = vmatpush.bf16.msrb.mxu1 %v2088_v18  ;;  %v541_v17 = vrot.slane %v2442_v11, 1  ;;  %v483_v18 = vor.u32 %v481_v15, %v479_v62  ;;  %v517_v62 = vshll.u32 %v2480_v33, 16  ;;  %v2616_v15 = vrot.slane %v2480_v33, 1 }
  0x53   : > { %1215 = vmatpush.bf16.msrb.mxu3 %v2104_v19  ;;  %1264 = vmatpush.bf16.msrb.mxu0 %v2112_v20  ;;  %v487_v19 = vrot.slane %v485_v16, 1  ;;  %v2530_v20 = vsel %vm537_vm1, %v539_v58, %v541_v17  ;;  %v2123_v58 = vld [vmem:[%s2429_s14 + $0x188] sm:$0xff] }
  0x55   : > { %1167 = vmatpush.bf16.msrb.mxu2 %v2095_v21  ;;  %1118 = vmatpush.bf16.msrb.mxu1 %v2087_v22  ;;  %v2533_v21 = vsel %vm460_vm0, %v483_v18, %v487_v19  ;;  %v2126_v22 = vld [vmem:[%s2429_s14 + $0x1a0] sm:$0xff]  ;;  %v2619_v18 = vld [vmem:[%s2417_s4 + $0x48] sm:$0xff]  }
  0x57   : > { %1216 = vmatpush.bf16.msrb.mxu3 %v2103_v23  ;;  %1265 = vmatpush.bf16.msrb.mxu0 %v2111_v24  ;;  %v2134_v23 = vld [vmem:[%s2429_s14 + $0x1e0] sm:$0xff] }
  0x58   : > { %v2118_v24 = vld [vmem:[%s2429_s14 + $0x160] sm:$0xff] }
  0x59   : > { %1168 = vmatpush.bf16.msrb.mxu2 %v2094_v25  ;;  %1119 = vmatpush.bf16.msrb.mxu1 %v2086_v26  ;;  %v2142_v25 = vld [vmem:[%s2429_s14 + $0x220] sm:$0xff]  ;;  %v489_v26 = vshrl.u32 %v2474_v31, 16 }
  0x5b   : > { %1217 = vmatpush.bf16.msrb.mxu3 %v2102_v27  ;;  %1266 = vmatpush.bf16.msrb.mxu0 %v2110_v28  ;;  %v493_v27 = vshll.u32 %v2445_v12, 16  ;;  %v543_v28 = vrot.slane %v2474_v31, 1 }
  0x5c   : > { %1090 = vmatmul.bf16.gmra.mxu1 %v2474_v31  ;;  %1100 = vmatmul.bf16.gmra.mxu2 %v2477_v32 }
  0x5d   : > { %1169 = vmatpush.bf16.msrb.mxu2 %v2093_v29  ;;  %1120 = vmatpush.bf16.msrb.mxu1 %v2085_v30  ;;  %v491_v29 = vor.u32 %v489_v26, %v487_v19  ;;  %v495_v30 = vrot.slane %v493_v27, 1  ;;  %v2563_v45 = vsel %vm537_vm1, %v543_v28, %v545_v42  ;;  %v2152_v26 = vunpack.c.l.b16 %v2619_v18 }
  0x5e   : > { %1110 = vmatmul.bf16.gmra.mxu3 %v2480_v33  ;;  %1080 = vmatmul.bf16.gmra.mxu0 %v2483_v34 }
  0x5f   : > { %1218 = vmatpush.bf16.msrb.mxu3 %v2101_v35  ;;  %1267 = vmatpush.bf16.msrb.mxu0 %v2109_v36  ;;  %v2549_v35 = vsel %vm460_vm0, %v491_v29, %v495_v30  ;;  %v2125_v36 = vld [vmem:[%s2429_s14 + $0x198] sm:$0xff] }
  0x61   : > { %1170 = vmatpush.bf16.msrb.mxu2 %v2092_v37  ;;  %1121 = vmatpush.bf16.msrb.mxu1 %v2084_v38  ;;  %v2133_v37 = vld [vmem:[%s2429_s14 + $0x1d8] sm:$0xff] }
  0x62   : > { %v2117_v38 = vld [vmem:[%s2429_s14 + $0x158] sm:$0xff] }
  0x63   : > { %1219 = vmatpush.bf16.msrb.mxu3 %v2100_v40  ;;  %1268 = vmatpush.bf16.msrb.mxu0 %v2108_v41  ;;  %v497_v40 = vshrl.u32 %v2445_v12, 16  ;;  %v501_v41 = vshll.u32 %v2477_v32, 16 }
  0x65   : > { %1171 = vmatpush.bf16.msrb.mxu2 %v2091_v43  ;;  %1122 = vmatpush.bf16.msrb.mxu1 %v2083_v44  ;;  %v499_v43 = vor.u32 %v497_v40, %v495_v30  ;;  %v503_v44 = vrot.slane %v501_v41, 1 }
  0x67   : > { %1220 = vmatpush.bf16.msrb.mxu3 %v2099_v47  ;;  %1269 = vmatpush.bf16.msrb.mxu0 %v2107_v48  ;;  %v2566_v46 = vsel %vm460_vm0, %v499_v43, %v503_v44  ;;  %v2124_v47 = vld [vmem:[%s2429_s14 + $0x190] sm:$0xff] }
  0x68   : > { %v2132_v48 = vld [vmem:[%s2429_s14 + $0x1d0] sm:$0xff] }
  0x69   : > { %1172 = vmatpush.bf16.msrb.mxu2 %v2090_v52  ;;  %1123 = vmatpush.bf16.msrb.mxu1 %v2082_v53  ;;  %v509_v52 = vshll.u32 %v2448_v13, 16  ;;  %v547_v53 = vrot.slane %v2477_v32, 1 }
  0x6b   : > { %1221 = vmatpush.bf16.msrb.mxu3 %v2098_v59  ;;  %1270 = vmatpush.bf16.msrb.mxu0 %v2106_v60  ;;  %v2580_v56 = vsel %vm537_vm1, %v545_v42, %v547_v53  ;;  %v2131_v59 = vld [vmem:[%s2429_s14 + $0x1c8] sm:$0xff] }
  0x6c   : > { %1124 = vmatmul.bf16.vlgmr.msrb.gmra.mxu1 %v472_v1  ;;  %1173 = vmatmul.bf16.vlgmr.msrb.gmra.mxu2 %v540_v2  ;;  %v2115_v60 = vld [vmem:[%s2429_s14 + $0x148] sm:$0xff]  ;;  %v519_v2 = vrot.slane %v517_v62, 1 }
  0x6d   : > { %1361 = vmatpush.bf16.msra.mxu2 %v2129_v54  ;;  %1312 = vmatpush.bf16.msra.mxu1 %v2121_v55  ;;  %v507_v54 = vor.u32 %v505_v51, %v503_v44  ;;  %v511_v55 = vrot.slane %v509_v52, 1 }
  0x6e   : > { %1222 = vmatmul.bf16.vlgmr.msrb.gmra.mxu3 %v2483_v34  ;;  %1271 = vmatmul.bf16.vlgmr.msrb.gmra.mxu0 %v480_v3  ;;  %v2546_v34 = vsel %vm537_vm1, %v541_v17, %v543_v28  ;;  %v2636_v28 = vpack.c.b16 %v2152_v26, %v2152_v26 }
  0x6f   : > { %1410 = vmatpush.bf16.msra.mxu3 %v2137_v63  ;;  %1459 = vmatpush.bf16.msra.mxu0 %v2145_v0  ;;  %v2583_v57 = vsel %vm460_vm0, %v507_v54, %v511_v55  ;;  %v2139_v63 = vld [vmem:[%s2429_s14 + $0x208] sm:$0xff]  ;;  %v549_v0 = vrot.slane %v2448_v13, 1  ;;  %v515_v1 = vor.u32 %v513_v61, %v511_v55 }
  0x70   : > { %v579_v40 = vshll.u32 %v2636_v28, 16 }
  0x71   : > { %1362 = vmatpush.bf16.msra.mxu2 %v2128_v4  ;;  %1313 = vmatpush.bf16.msra.mxu1 %v2120_v5  ;;  %v2600_v4 = vsel %vm460_vm0, %v515_v1, %v519_v2  ;;  %v2122_v5 = vld [vmem:[%s2429_s14 + $0x180] sm:$0xff] }
  0x72   : > { %v581_v44 = vrot.slane %v579_v40, 1 }
  0x73   : > { %1411 = vmatpush.bf16.msra.mxu3 %v2136_v6  ;;  %1460 = vmatpush.bf16.msra.mxu0 %v2144_v7  ;;  %v2130_v6 = vld [vmem:[%s2429_s14 + $0x1c0] sm:$0xff] }
  0x74   : > { %v2609_v7 = vld [vmem:[%s2417_s4 + $0x40] sm:$0xff]  }
  0x75   : > { %1363 = vmatpush.bf16.msra.mxu2 %v2127_v8  ;;  %1314 = vmatpush.bf16.msra.mxu1 %v2119_v9  ;;  %v2114_v8 = vld [vmem:[%s2429_s14 + $0x140] sm:$0xff]  ;;  %v521_v9 = vshrl.u32 %v2480_v33, 16 }
  0x77   : > { %1412 = vmatpush.bf16.msra.mxu3 %v2135_v10  ;;  %1461 = vmatpush.bf16.msra.mxu0 %v2143_v14  ;;  %v571_v10 = vshll.u32 %v2609_v7, 16  ;;  %v2138_v14 = vld [vmem:[%s2429_s14 + $0x200] sm:$0xff]  ;;  %v523_v16 = vor.u32 %v521_v9, %v519_v2 }
  0x79   : > { %1364 = vmatpush.bf16.msra.mxu2 %v2126_v22  ;;  %1315 = vmatpush.bf16.msra.mxu1 %v2118_v24  ;;  %v573_v17 = vrot.slane %v571_v10, 1  ;;  %v2625_v22 = vsel %vm537_vm1, %v549_v0, %v2616_v15 }
  0x7b   : > { %1413 = vmatpush.bf16.msra.mxu3 %v2134_v23  ;;  %1462 = vmatpush.bf16.msra.mxu0 %v2142_v25  ;;  %v2148_v23 = vunpack.c.l.b16 %v2609_v7  ;;  %v2629_v25 = vsel %vm460_vm0, %v523_v16, %v573_v17 }
  0x7c   : > { %1129 = vmatmul.bf16.gmra.mxu1 %v480_v3  ;;  %1178 = vmatmul.bf16.gmra.mxu2 %v2530_v20  ;;  %v2597_v3 = vsel %vm537_vm1, %v547_v53, %v549_v0 }
  0x7d   : > { %1365 = vmatpush.bf16.msra.mxu2 %v2125_v36  ;;  %1316 = vmatpush.bf16.msra.mxu1 %v2117_v38  ;;  %v459_v27 = vpack.c.b16 %v2148_v23, %v2148_v23 }
  0x7e   : > { %1227 = vmatmul.bf16.gmra.mxu3 %v2442_v11  ;;  %1276 = vmatmul.bf16.gmra.mxu0 %v2533_v21 }
  0x7f   : > { %1414 = vmatpush.bf16.msra.mxu3 %v2133_v37  ;;  %1463 = vmatpush.bf16.msra.mxu0 %v2141_v39  ;;  %v525_v37 = vshll.u32 %v459_v27, 16  ;;  %v575_v39 = vshrl.u32 %v2609_v7, 16  ;;  %v553_v42 = vrot.slane %v459_v27, 1 }
  0x81   : > { %1366 = vmatpush.bf16.msra.mxu2 %v2124_v47  ;;  %1317 = vmatpush.bf16.msra.mxu1 %v2116_v49  ;;  %v527_v41 = vrot.slane %v525_v37, 1  ;;  %v2646_v43 = vor.u32 %v575_v39, %v573_v17  ;;  %v554_v51 = vsel %vm537_vm1, %v2616_v15, %v553_v42 }
  0x83   : > { %1415 = vmatpush.bf16.msra.mxu3 %v2132_v48  ;;  %1464 = vmatpush.bf16.msra.mxu0 %v2140_v50  ;;  %v528_v50 = vsel %vm460_vm0, %v523_v16, %v527_v41  ;;  %v582_v53 = vsel %vm460_vm0, %v2646_v43, %v581_v44 }
  0x85   : > { %1367 = vmatpush.bf16.msra.mxu2 %v2123_v58  ;;  %1318 = vmatpush.bf16.msra.mxu1 %v2115_v60 }
  0x87   : > { %1416 = vmatpush.bf16.msra.mxu3 %v2131_v59  ;;  %1465 = vmatpush.bf16.msra.mxu0 %v2139_v63 }
  0x89   : > { %1368 = vmatpush.bf16.msra.mxu2 %v2122_v5  ;;  %1319 = vmatpush.bf16.msra.mxu1 %v2114_v8 }
  0x8b   : > { %1417 = vmatpush.bf16.msra.mxu3 %v2130_v6  ;;  %1466 = vmatpush.bf16.msra.mxu0 %v2138_v14 }
  0x8c   : > { %1134 = vmatmul.bf16.gmra.mxu1 %v2533_v21  ;;  %1183 = vmatmul.bf16.gmra.mxu2 %v2546_v34 }
  0x8e   : > { %1232 = vmatmul.bf16.gmra.mxu3 %v2474_v31  ;;  %1281 = vmatmul.bf16.gmra.mxu0 %v2549_v35 }
  0x9c   : > { %1139 = vmatmul.bf16.gmra.mxu1 %v2549_v35  ;;  %1188 = vmatmul.bf16.gmra.mxu2 %v2563_v45 }
  0x9e   : > { %1237 = vmatmul.bf16.gmra.mxu3 %v2445_v12  ;;  %1286 = vmatmul.bf16.gmra.mxu0 %v2566_v46 }
  0xac   : > { %1144 = vmatmul.bf16.gmra.mxu1 %v2566_v46  ;;  %1193 = vmatmul.bf16.gmra.mxu2 %v2580_v56 }
  0xae   : > { %1242 = vmatmul.bf16.gmra.mxu3 %v2477_v32  ;;  %1291 = vmatmul.bf16.gmra.mxu0 %v2583_v57 }
  0xbc   : > { %1149 = vmatmul.bf16.gmra.mxu1 %v2583_v57  ;;  %1198 = vmatmul.bf16.gmra.mxu2 %v2597_v3 }
  0xbe   : > { %1247 = vmatmul.bf16.gmra.mxu3 %v2448_v13  ;;  %1296 = vmatmul.bf16.gmra.mxu0 %v2600_v4 }
  0xc9   : > { %v2621_v19 = vpop.f32.mrf.mxu1 }
  0xcb   : > { %v1076_v24 = vpop.f32.mrf.mxu0 }
  0xcc   : > { %1154 = vmatmul.bf16.gmra.mxu1 %v2600_v4  ;;  %1203 = vmatmul.bf16.gmra.mxu2 %v2625_v22 }
  0xce   : > { %1252 = vmatmul.bf16.gmra.mxu3 %v2480_v33  ;;  %1301 = vmatmul.bf16.gmra.mxu0 %v2629_v25 }
  0xcf   : > { %v2638_v29 = vpop.f32.mrf.mxu2 }
  0xd1   : > { %v2640_v30 = vpop.f32.mrf.mxu3  ;;  %v2642_v36 = vpop.f32.mrf.mxu1 }
  0xd3   : > { %v1078_v38 = vpop.f32.mrf.mxu0 }
  0xd7   : > { %v2648_v47 = vpop.f32.mrf.mxu2 }
  0xd9   : > { %v2650_v48 = vpop.f32.mrf.mxu3  ;;  %v2652_v49 = vpop.f32.mrf.mxu1 }
  0xdb   : > { %v1081_v52 = vpop.f32.mrf.mxu0 }
  0xdc   : > { %1159 = vmatmul.bf16.gmra.mxu1 %v528_v50  ;;  %1208 = vmatmul.bf16.gmra.mxu2 %v554_v51 }
  0xde   : > { %1257 = vmatmul.bf16.gmra.mxu3 %v2609_v7  ;;  %1306 = vmatmul.bf16.gmra.mxu0 %v582_v53 }
  0xdf   : > { %v2660_v54 = vpop.f32.mrf.mxu2 }
  0xe1   : > { %v2662_v55 = vpop.f32.mrf.mxu3  ;;  %v2664_v58 = vpop.f32.mrf.mxu1 }
  0xe3   : > { %v1083_v59 = vpop.f32.mrf.mxu0 }
  0xe7   : > { %v2666_v60 = vpop.f32.mrf.mxu2 }
  0xe9   : > { %v2668_v61 = vpop.f32.mrf.mxu3  ;;  %v1125_v62 = vpop.f32.mrf.mxu1 }
  0xea   : > { %v1126_v63 = vadd.f32 %v1125_v62, %v1076_v24 }
  0xeb   : > { %v1272_v0 = vpop.f32.mrf.mxu0 }
  0xec   : > { %1320 = vmatmul.bf16.vlgmr.msra.gmra.mxu1 %v2530_v20  ;;  %1369 = vmatmul.bf16.vlgmr.msra.gmra.mxu2 %v2442_v11 }
  0xee   : > { %1418 = vmatmul.bf16.vlgmr.msra.gmra.mxu3 %v2533_v21  ;;  %1467 = vmatmul.bf16.vlgmr.msra.gmra.mxu0 %v2546_v34 }
  0xef   : > { %v1174_v1 = vpop.f32.mrf.mxu2 }
  0xf0   : > { %v1175_v2 = vadd.f32 %v1174_v1, %v1126_v63 }
  0xf1   : > { %v1223_v5 = vpop.f32.mrf.mxu3  ;;  %v1127_v6 = vpop.f32.mrf.mxu1 }
  0xf2   : > { %v1224_v8 = vadd.f32 %v1223_v5, %v1175_v2  ;;  %v1128_v9 = vadd.f32 %v1127_v6, %v1078_v38 }
  0xf3   : > { %v1274_v10 = vpop.f32.mrf.mxu0 }
  0xf4   : > { %v2674_v14 = vadd.f32 %v1272_v0, %v1224_v8 }
  0xf7   : > { %v1176_v16 = vpop.f32.mrf.mxu2 }
  0xf8   : > { %v1177_v17 = vadd.f32 %v1176_v16, %v1128_v9 }
  0xf9   : > { %v1225_v23 = vpop.f32.mrf.mxu3  ;;  %v1130_v24 = vpop.f32.mrf.mxu1 }
  0xfa   : > { %v1226_v20 = vadd.f32 %v1225_v23, %v1177_v17  ;;  %v1131_v26 = vadd.f32 %v1130_v24, %v1081_v52 }
  0xfb   : > { %v1277_v11 = vpop.f32.mrf.mxu0 }
  0xfc   : > { %1325 = vmatmul.bf16.gmra.mxu1 %v2546_v34  ;;  %1374 = vmatmul.bf16.gmra.mxu2 %v2474_v31  ;;  %v2678_v21 = vadd.f32 %v1274_v10, %v1226_v20 }
  0xfe   : > { %1423 = vmatmul.bf16.gmra.mxu3 %v2549_v35  ;;  %1472 = vmatmul.bf16.gmra.mxu0 %v2563_v45 }
  0xff   : > { %v1179_v27 = vpop.f32.mrf.mxu2 }
 0x100   : > { %v1180_v37 = vadd.f32 %v1179_v27, %v1131_v26 }
 0x101   : > { %v1228_v38 = vpop.f32.mrf.mxu3  ;;  %v1132_v39 = vpop.f32.mrf.mxu1 }
 0x102   : > { %v1229_v40 = vadd.f32 %v1228_v38, %v1180_v37  ;;  %v1133_v41 = vadd.f32 %v1132_v39, %v1083_v59 }
 0x103   : > { %v1279_v42 = vpop.f32.mrf.mxu0 }
 0x104   : > { %v2682_v44 = vadd.f32 %v1277_v11, %v1229_v40 }
 0x107   : > { %v1181_v50 = vpop.f32.mrf.mxu2 }
 0x108   : > { %v1182_v51 = vadd.f32 %v1181_v50, %v1133_v41 }
 0x109   : > { %v1230_v34 = vpop.f32.mrf.mxu3  ;;  %v1135_v52 = vpop.f32.mrf.mxu1 }
 0x10a   : > { %v1231_v31 = vadd.f32 %v1230_v34, %v1182_v51  ;;  %v1136_v53 = vadd.f32 %v1135_v52, %v2621_v19 }
 0x10b   : > { %v1282_v62 = vpop.f32.mrf.mxu0 }
 0x10c   : > { %1330 = vmatmul.bf16.gmra.mxu1 %v2563_v45  ;;  %1379 = vmatmul.bf16.gmra.mxu2 %v2445_v12  ;;  %v2687_v35 = vadd.f32 %v1279_v42, %v1231_v31 }
 0x10e   : > { %1428 = vmatmul.bf16.gmra.mxu3 %v2566_v46  ;;  %1477 = vmatmul.bf16.gmra.mxu0 %v2580_v56 }
 0x10f   : > { %v1184_v59 = vpop.f32.mrf.mxu2 }
 0x110   : > { %v1185_v63 = vadd.f32 %v1184_v59, %v1136_v53 }
 0x111   : > { %v1233_v0 = vpop.f32.mrf.mxu3  ;;  %v1137_v1 = vpop.f32.mrf.mxu1 }
 0x112   : > { %v1234_v2 = vadd.f32 %v1233_v0, %v1185_v63  ;;  %v1138_v5 = vadd.f32 %v1137_v1, %v2642_v36 }
 0x113   : > { %v1284_v6 = vpop.f32.mrf.mxu0 }
 0x114   : > { %v2692_v19 = vadd.f32 %v1282_v62, %v1234_v2 }
 0x117   : > { %v1186_v8 = vpop.f32.mrf.mxu2 }
 0x118   : > { %v1187_v45 = vadd.f32 %v1186_v8, %v1138_v5 }
 0x119   : > { %v1235_v9 = vpop.f32.mrf.mxu3  ;;  %v1140_v12 = vpop.f32.mrf.mxu1 }
 0x11a   : > { %v1236_v10 = vadd.f32 %v1235_v9, %v1187_v45  ;;  %v1141_v16 = vadd.f32 %v1140_v12, %v2652_v49 }
 0x11b   : > { %v1287_v46 = vpop.f32.mrf.mxu0 }
 0x11c   : > { %1335 = vmatmul.bf16.gmra.mxu1 %v2580_v56  ;;  %1384 = vmatmul.bf16.gmra.mxu2 %v2477_v32  ;;  %v2697_v17 = vadd.f32 %v1284_v6, %v1236_v10  ;;  %v613_v10 = vrot.slane %v2619_v18, 1 }
 0x11e   : > { %1433 = vmatmul.bf16.gmra.mxu3 %v2583_v57  ;;  %1482 = vmatmul.bf16.gmra.mxu0 %v2597_v3 }
 0x11f   : > { %v1189_v36 = vpop.f32.mrf.mxu2 }
 0x120   : > { %v1190_v23 = vadd.f32 %v1189_v36, %v1141_v16 }
 0x121   : > { %v1238_v24 = vpop.f32.mrf.mxu3  ;;  %v1142_v20 = vpop.f32.mrf.mxu1 }
 0x122   : > { %v1239_v26 = vadd.f32 %v1238_v24, %v1190_v23  ;;  %v1143_v11 = vadd.f32 %v1142_v20, %v2664_v58 }
 0x123   : > { %v1289_v27 = vpop.f32.mrf.mxu0 }
 0x124   : > { %v2702_v49 = vadd.f32 %v1287_v46, %v1239_v26 }
 0x127   : > { %v1191_v37 = vpop.f32.mrf.mxu2 }
 0x128   : > { %v1192_v56 = vadd.f32 %v1191_v37, %v1143_v11 }
 0x129   : > { %v1240_v38 = vpop.f32.mrf.mxu3  ;;  %v1145_v32 = vpop.f32.mrf.mxu1 }
 0x12a   : > { %v1241_v39 = vadd.f32 %v1240_v38, %v1192_v56  ;;  %v1146_v58 = vadd.f32 %v1145_v32, %v2638_v29 }
 0x12b   : > { %v1292_v40 = vpop.f32.mrf.mxu0 }
 0x12c   : > { %1340 = vmatmul.bf16.gmra.mxu1 %v2597_v3  ;;  %1389 = vmatmul.bf16.gmra.mxu2 %v2448_v13  ;;  %v2706_v57 = vadd.f32 %v1289_v27, %v1241_v39  ;;  %v585_v13 = vrot.slane %v2609_v7, 1 }
 0x12e   : > { %1438 = vmatmul.bf16.gmra.mxu3 %v2600_v4  ;;  %1487 = vmatmul.bf16.gmra.mxu0 %v2625_v22  ;;  %v586_v29 = vsel %vm537_vm1, %v2616_v15, %v585_v13  ;;  %v599_v15 = vshll.u32 %v2619_v18, 16  ;;  %v614_v26 = vsel %vm537_vm1, %v585_v13, %v613_v10 }
 0x12f   : > { %v1194_v41 = vpop.f32.mrf.mxu2 }
 0x130   : > { %v1195_v42 = vadd.f32 %v1194_v41, %v1146_v58 }
 0x131   : > { %v1243_v50 = vpop.f32.mrf.mxu3  ;;  %v1147_v51 = vpop.f32.mrf.mxu1 }
 0x132   : > { %v1244_v34 = vadd.f32 %v1243_v50, %v1195_v42  ;;  %v1148_v3 = vadd.f32 %v1147_v51, %v2648_v47 }
 0x133   : > { %v1294_v52 = vpop.f32.mrf.mxu0 }
 0x134   : > { %v2711_v31 = vadd.f32 %v1292_v40, %v1244_v34 }
 0x137   : > { %v1196_v53 = vpop.f32.mrf.mxu2 }
 0x138   : > { %v1197_v62 = vadd.f32 %v1196_v53, %v1148_v3 }
 0x139   : > { %v1245_v59 = vpop.f32.mrf.mxu3  ;;  %v1150_v4 = vpop.f32.mrf.mxu1 }
 0x13a   : > { %v1246_v63 = vadd.f32 %v1245_v59, %v1197_v62  ;;  %v1151_v47 = vadd.f32 %v1150_v4, %v2660_v54 }
 0x13b   : > { %v1297_v0 = vpop.f32.mrf.mxu0 }
 0x13c   : > { %1345 = vmatmul.bf16.gmra.mxu1 %v2625_v22  ;;  %1394 = vmatmul.bf16.gmra.mxu2 %v2480_v33  ;;  %v2719_v1 = vadd.f32 %v1294_v52, %v1246_v63  ;;  %v601_v22 = vrot.slane %v599_v15, 1 }
 0x13e   : > { %1443 = vmatmul.bf16.gmra.mxu3 %v2629_v25  ;;  %1492 = vmatmul.bf16.gmra.mxu0 %v586_v29  ;;  %v261_v25 = vld [vmem:[%s2417_s4 + $0x50] sm:$0xf]  ;;  %v602_v20 = vsel %vm460_vm0, %v2646_v43, %v601_v22  ;;  %v603_v43 = vshrl.u32 %v2619_v18, 16 }
 0x13f   : > { %v1199_v2 = vpop.f32.mrf.mxu2  ;;  %v596_v11 = vunpack.c.l.b16 %v261_v25 }
 0x140   : > { %v1200_v5 = vadd.f32 %v1199_v2, %v1151_v47  ;;  %v605_v51 = vor.u32 %v603_v43, %v601_v22 }
 0x141   : > { %v1248_v6 = vpop.f32.mrf.mxu3  ;;  %v1152_v8 = vpop.f32.mrf.mxu1  ;;  %v597_v37 = vpack.c.b16 %v596_v11, %v596_v11 }
 0x142   : > { %v1249_v45 = vadd.f32 %v1248_v6, %v1200_v5  ;;  %v1153_v33 = vadd.f32 %v1152_v8, %v2666_v60 }
 0x143   : > { %v1299_v9 = vpop.f32.mrf.mxu0  ;;  %v607_v41 = vshll.u32 %v597_v37, 16  ;;  %v615_v52 = vrot.slane %v597_v37, 1 }
 0x144   : > { %v2724_v12 = vadd.f32 %v1297_v0, %v1249_v45 }
 0x145   : > { %v609_v34 = vrot.slane %v607_v41, 1 }
 0x147   : > { %v1201_v16 = vpop.f32.mrf.mxu2  ;;  %v610_v0 = vsel %vm460_vm0, %v605_v51, %v609_v34 }
 0x148   : > { %v1202_v46 = vadd.f32 %v1201_v16, %v1153_v33 }
 0x149   : > { %v1250_v36 = vpop.f32.mrf.mxu3  ;;  %v1155_v54 = vpop.f32.mrf.mxu1 }
 0x14a   : > { %v1251_v23 = vadd.f32 %v1250_v36, %v1202_v46  ;;  %v1156_v27 = vadd.f32 %v1155_v54, %v2640_v30 }
 0x14b   : > { %v1302_v24 = vpop.f32.mrf.mxu0 }
 0x14c   : > { %1350 = vmatmul.bf16.gmra.mxu1 %v586_v29  ;;  %1399 = vmatmul.bf16.gmra.mxu2 %v2609_v7  ;;  %v2733_v60 = vadd.f32 %v1299_v9, %v1251_v23  ;;  %v587_v7 = vrot.slane %v2636_v28, 1  ;;  %v616_v29 = vsel %vm537_vm1, %v613_v10, %v615_v52 }
 0x14e   : > { %1448 = vmatmul.bf16.gmra.mxu3 %v602_v20  ;;  %1497 = vmatmul.bf16.gmra.mxu0 %v614_v26  ;;  %v588_v59 = vsel %vm537_vm1, %v585_v13, %v587_v7  ;;  %v619_v26 = vld [vmem:[#allocation2 + $0x30] sm:$0xff] }
 0x14f   : > { %v1204_v56 = vpop.f32.mrf.mxu2 }
 0x150   : > { %v1205_v38 = vadd.f32 %v1204_v56, %v1156_v27 }
 0x151   : > { %v1253_v32 = vpop.f32.mrf.mxu3  ;;  %v1157_v39 = vpop.f32.mrf.mxu1 }
 0x152   : > { %v1254_v40 = vadd.f32 %v1253_v32, %v1205_v38  ;;  %v1158_v50 = vadd.f32 %v1157_v39, %v2650_v48 }
 0x153   : > { %v1304_v58 = vpop.f32.mrf.mxu0 }
 0x154   : > { %v2737_v42 = vadd.f32 %v1302_v24, %v1254_v40 }
 0x157   : > { %v1206_v30 = vpop.f32.mrf.mxu2 }
 0x158   : > { %v1207_v3 = vadd.f32 %v1206_v30, %v1158_v50 }
 0x159   : > { %v1255_v53 = vpop.f32.mrf.mxu3  ;;  %v1160_v62 = vpop.f32.mrf.mxu1 }
 0x15a   : > { %v1256_v4 = vadd.f32 %v1255_v53, %v1207_v3  ;;  %v1161_v48 = vadd.f32 %v1160_v62, %v2662_v55 }
 0x15b   : > { %v1307_v63 = vpop.f32.mrf.mxu0 }
 0x15c   : > { %1355 = vmatmul.bf16.gmra.mxu1 %v588_v59  ;;  %1404 = vmatmul.bf16.gmra.mxu2 %v2619_v18  ;;  %v2745_v28 = vadd.f32 %v1304_v58, %v1256_v4  ;;  %v620_v58 = vld [vmem:[#allocation2] sm:$0xff] }
 0x15e   : > { %1453 = vmatmul.bf16.gmra.mxu3 %v610_v0  ;;  %1502 = vmatmul.bf16.gmra.mxu0 %v616_v29 }
 0x15f   : > { %v1209_v47 = vpop.f32.mrf.mxu2 }
 0x160   : > { %v1210_v2 = vadd.f32 %v1209_v47, %v1161_v48 }
 0x161   : > { %v1258_v5 = vpop.f32.mrf.mxu3  ;;  %v1162_v6 = vpop.f32.mrf.mxu1 }
 0x162   : > { %v1259_v13 = vadd.f32 %v1258_v5, %v1210_v2  ;;  %v1163_v9 = vadd.f32 %v1162_v6, %v2668_v61 }
 0x163   : > { %v1309_v8 = vpop.f32.mrf.mxu0 }
 0x164   : > { %v2748_v45 = vadd.f32 %v1307_v63, %v1259_v13 }
 0x167   : > { %v1211_v15 = vpop.f32.mrf.mxu2 }
 0x168   : > { %v1212_v33 = vadd.f32 %v1211_v15, %v1163_v9 }
 0x169   : > { %v1260_v22 = vpop.f32.mrf.mxu3  ;;  %v1321_v18 = vpop.f32.mrf.mxu1 }
 0x16a   : > { %v1261_v10 = vadd.f32 %v1260_v22, %v1212_v33  ;;  %v1322_v55 = vadd.f32 %v1321_v18, %v2674_v14 }
 0x16b   : > { %v1468_v16 = vpop.f32.mrf.mxu0 }
 0x16c   : > { %v2751_v25 = vadd.f32 %v1309_v8, %v1261_v10 }
 0x16f   : > { %v1370_v46 = vpop.f32.mrf.mxu2 }
 0x170   : > { %v1371_v36 = vadd.f32 %v1370_v46, %v1322_v55 }
 0x171   : > { %v1419_v54 = vpop.f32.mrf.mxu3  ;;  %v1323_v23 = vpop.f32.mrf.mxu1 }
 0x172   : > { %v1420_v24 = vadd.f32 %v1419_v54, %v1371_v36  ;;  %v1324_v61 = vadd.f32 %v1323_v23, %v2678_v21  ;;  %v621_v21 = vld [vmem:[#allocation2 + $0x58] sm:$0xff] }
 0x173   : > { %v1470_v20 = vpop.f32.mrf.mxu0 }
 0x174   : > { %v1469_v11 = vadd.f32 %v1468_v16, %v1420_v24 }
 0x176   : > { %v1508_v27 = vadd.f32 %v1469_v11, %v619_v26 }
 0x177   : > { %v1372_v37 = vpop.f32.mrf.mxu2 }
 0x178   : > { %1524 = vst [vmem:[#allocation2 + $0x30] sm:$0xff] %v1508_v27  ;;  %v1373_v56 = vadd.f32 %v1372_v37, %v1324_v61 }
 0x179   : > { %v1421_v38 = vpop.f32.mrf.mxu3  ;;  %v1326_v32 = vpop.f32.mrf.mxu1 }
 0x17a   : > { %v1422_v39 = vadd.f32 %v1421_v38, %v1373_v56  ;;  %v1327_v41 = vadd.f32 %v1326_v32, %v2682_v44  ;;  %v622_v44 = vld [vmem:[#allocation2 + $0x18] sm:$0xff] }
 0x17b   : > { %v1473_v40 = vpop.f32.mrf.mxu0 }
 0x17c   : > { %v1471_v14 = vadd.f32 %v1470_v20, %v1422_v39 }
 0x17e   : > { %v1509_v43 = vadd.f32 %v1471_v14, %v620_v58 }
 0x17f   : > { %v1375_v7 = vpop.f32.mrf.mxu2 }
 0x180   : > { %1525 = vst [vmem:[#allocation2] sm:$0xff] %v1509_v43  ;;  %v1376_v50 = vadd.f32 %v1375_v7, %v1327_v41 }
 0x181   : > { %v1424_v51 = vpop.f32.mrf.mxu3  ;;  %v1328_v34 = vpop.f32.mrf.mxu1 }
 0x182   : > { %v1425_v52 = vadd.f32 %v1424_v51, %v1376_v50  ;;  %v1329_v62 = vadd.f32 %v1328_v34, %v2687_v35  ;;  %v623_v35 = vld [vmem:[#allocation2 + $0x50] sm:$0xff] }
 0x183   : > { %v1475_v30 = vpop.f32.mrf.mxu0 }
 0x184   : > { %v1474_v3 = vadd.f32 %v1473_v40, %v1425_v52 }
 0x186   : > { %v1510_v53 = vadd.f32 %v1474_v3, %v621_v21 }
 0x187   : > { %v1377_v59 = vpop.f32.mrf.mxu2 }
 0x188   : > { %1526 = vst [vmem:[#allocation2 + $0x58] sm:$0xff] %v1510_v53  ;;  %v1378_v4 = vadd.f32 %v1377_v59, %v1329_v62 }
 0x189   : > { %v1426_v63 = vpop.f32.mrf.mxu3  ;;  %v1331_v0 = vpop.f32.mrf.mxu1 }
 0x18a   : > { %v1427_v29 = vadd.f32 %v1426_v63, %v1378_v4  ;;  %v1332_v5 = vadd.f32 %v1331_v0, %v2692_v19  ;;  %v624_v19 = vld [vmem:[#allocation2 + $0x68] sm:$0xff] }
 0x18b   : > { %v1478_v48 = vpop.f32.mrf.mxu0 }
 0x18c   : > { %v1476_v47 = vadd.f32 %v1475_v30, %v1427_v29 }
 0x18e   : > { %v1511_v2 = vadd.f32 %v1476_v47, %v622_v44 }
 0x18f   : > { %v1380_v6 = vpop.f32.mrf.mxu2 }
 0x190   : > { %1527 = vst [vmem:[#allocation2 + $0x18] sm:$0xff] %v1511_v2  ;;  %v1381_v13 = vadd.f32 %v1380_v6, %v1332_v5 }
 0x191   : > { %v1429_v8 = vpop.f32.mrf.mxu3  ;;  %v1333_v9 = vpop.f32.mrf.mxu1 }
 0x192   : > { %v1430_v15 = vadd.f32 %v1429_v8, %v1381_v13  ;;  %v1334_v10 = vadd.f32 %v1333_v9, %v2697_v17  ;;  %v625_v17 = vld [vmem:[#allocation2 + $0x8] sm:$0xff] }
 0x193   : > { %v1480_v33 = vpop.f32.mrf.mxu0 }
 0x194   : > { %v1479_v22 = vadd.f32 %v1478_v48, %v1430_v15 }
 0x196   : > { %v1512_v18 = vadd.f32 %v1479_v22, %v623_v35 }
 0x197   : > { %v1382_v16 = vpop.f32.mrf.mxu2 }
 0x198   : > { %1528 = vst [vmem:[#allocation2 + $0x50] sm:$0xff] %v1512_v18  ;;  %v1383_v55 = vadd.f32 %v1382_v16, %v1334_v10  ;;  %v629_v18 = vld [vmem:[#allocation2 + $0x10] sm:$0xff] }
 0x199   : > { %v1431_v46 = vpop.f32.mrf.mxu3  ;;  %v1336_v36 = vpop.f32.mrf.mxu1 }
 0x19a   : > { %v1432_v54 = vadd.f32 %v1431_v46, %v1383_v55  ;;  %v1337_v26 = vadd.f32 %v1336_v36, %v2702_v49  ;;  %v626_v49 = vld [vmem:[#allocation2 + $0x48] sm:$0xff] }
 0x19b   : > { %v1483_v23 = vpop.f32.mrf.mxu0 }
 0x19c   : > { %v1481_v24 = vadd.f32 %v1480_v33, %v1432_v54 }
 0x19e   : > { %v1513_v20 = vadd.f32 %v1481_v24, %v624_v19  ;;  %v630_v24 = vld [vmem:[#allocation2 + $0x38] sm:$0xff] }
 0x19f   : > { %v1385_v11 = vpop.f32.mrf.mxu2 }
 0x1a0   : > { %1529 = vst [vmem:[#allocation2 + $0x68] sm:$0xff] %v1513_v20  ;;  %v1386_v27 = vadd.f32 %v1385_v11, %v1337_v26 }
 0x1a1   : > { %v1434_v61 = vpop.f32.mrf.mxu3  ;;  %v1338_v37 = vpop.f32.mrf.mxu1 }
 0x1a2   : > { %v1435_v56 = vadd.f32 %v1434_v61, %v1386_v27  ;;  %v1339_v40 = vadd.f32 %v1338_v37, %v2706_v57  ;;  %v627_v57 = vld [vmem:[#allocation2 + $0x40] sm:$0xff] }
 0x1a3   : > { %v1485_v38 = vpop.f32.mrf.mxu0 }
 0x1a4   : > { %v1484_v32 = vadd.f32 %v1483_v23, %v1435_v56 }
 0x1a6   : > { %v1514_v39 = vadd.f32 %v1484_v32, %v625_v17  ;;  %v631_v17 = vld [vmem:[#allocation2 + $0x60] sm:$0xff] }
 0x1a7   : > { %v1387_v58 = vpop.f32.mrf.mxu2 }
 0x1a8   : > { %1530 = vst [vmem:[#allocation2 + $0x8] sm:$0xff] %v1514_v39  ;;  %v1388_v14 = vadd.f32 %v1387_v58, %v1339_v40 }
 0x1a9   : > { %v1436_v43 = vpop.f32.mrf.mxu3  ;;  %v1341_v41 = vpop.f32.mrf.mxu1 }
 0x1aa   : > { %v1437_v7 = vadd.f32 %v1436_v43, %v1388_v14  ;;  %v1342_v52 = vadd.f32 %v1341_v41, %v2711_v31  ;;  %v628_v31 = vld [vmem:[#allocation2 + $0x20] sm:$0xff] }
 0x1ab   : > { %v1488_v50 = vpop.f32.mrf.mxu0 }
 0x1ac   : > { %v1486_v51 = vadd.f32 %v1485_v38, %v1437_v7 }
 0x1ae   : > { %v1515_v34 = vadd.f32 %v1486_v51, %v626_v49 }
 0x1af   : > { %v1390_v30 = vpop.f32.mrf.mxu2 }
 0x1b0   : > { %1531 = vst [vmem:[#allocation2 + $0x48] sm:$0xff] %v1515_v34  ;;  %v1391_v21 = vadd.f32 %v1390_v30, %v1342_v52 }
 0x1b1   : > { %v1439_v3 = vpop.f32.mrf.mxu3  ;;  %v1343_v53 = vpop.f32.mrf.mxu1 }
 0x1b2   : > { %v1440_v62 = vadd.f32 %v1439_v3, %v1391_v21  ;;  %v1344_v0 = vadd.f32 %v1343_v53, %v2719_v1  ;;  %v633_v53 = vld [vmem:[#allocation2 + $0x78] sm:$0xff] }
 0x1b3   : > { %v1490_v59 = vpop.f32.mrf.mxu0 }
 0x1b4   : > { %v1489_v4 = vadd.f32 %v1488_v50, %v1440_v62  ;;  %v632_v50 = vld [vmem:[#allocation2 + $0x70] sm:$0xff] }
 0x1b6   : > { %v1516_v63 = vadd.f32 %v1489_v4, %v627_v57 }
 0x1b7   : > { %v1392_v29 = vpop.f32.mrf.mxu2 }
 0x1b8   : > { %1532 = vst [vmem:[#allocation2 + $0x40] sm:$0xff] %v1516_v63  ;;  %v1393_v48 = vadd.f32 %v1392_v29, %v1344_v0 }
 0x1b9   : > { %v1441_v44 = vpop.f32.mrf.mxu3  ;;  %v1346_v47 = vpop.f32.mrf.mxu1 }
 0x1ba   : > { %v1442_v2 = vadd.f32 %v1441_v44, %v1393_v48  ;;  %v1347_v8 = vadd.f32 %v1346_v47, %v2724_v12  ;;  %v634_v44 = vld [vmem:[#allocation2 + $0x28] sm:$0xff] }
 0x1bb   : > { %v1493_v5 = vpop.f32.mrf.mxu0 }
 0x1bc   : > { %v1491_v6 = vadd.f32 %v1490_v59, %v1442_v2 }
 0x1be   : > { %v1517_v13 = vadd.f32 %v1491_v6, %v628_v31 }
 0x1bf   : > { %v1395_v9 = vpop.f32.mrf.mxu2 }
 0x1c0   : > { %1533 = vst [vmem:[#allocation2 + $0x20] sm:$0xff] %v1517_v13  ;;  %v1396_v15 = vadd.f32 %v1395_v9, %v1347_v8 }
 0x1c1   : > { %v1444_v33 = vpop.f32.mrf.mxu3  ;;  %v1348_v35 = vpop.f32.mrf.mxu1 }
 0x1c2   : > { %v1445_v22 = vadd.f32 %v1444_v33, %v1396_v15  ;;  %v1349_v55 = vadd.f32 %v1348_v35, %v2733_v60 }
 0x1c3   : > { %v1495_v1 = vpop.f32.mrf.mxu0 }
 0x1c4   : > { %v1494_v10 = vadd.f32 %v1493_v5, %v1445_v22 }
 0x1c6   : > { %v1518_v16 = vadd.f32 %v1494_v10, %v629_v18 }
 0x1c7   : > { %v1397_v46 = vpop.f32.mrf.mxu2 }
 0x1c8   : > { %1534 = vst [vmem:[#allocation2 + $0x10] sm:$0xff] %v1518_v16  ;;  %v1398_v36 = vadd.f32 %v1397_v46, %v1349_v55 }
 0x1c9   : > { %v1446_v54 = vpop.f32.mrf.mxu3  ;;  %v1351_v23 = vpop.f32.mrf.mxu1 }
 0x1ca   : > { %v1447_v19 = vadd.f32 %v1446_v54, %v1398_v36  ;;  %v1352_v11 = vadd.f32 %v1351_v23, %v2737_v42 }
 0x1cb   : > { %v1498_v20 = vpop.f32.mrf.mxu0 }
 0x1cc   : > { %v1496_v12 = vadd.f32 %v1495_v1, %v1447_v19 }
 0x1ce   : > { %v1519_v26 = vadd.f32 %v1496_v12, %v630_v24 }
 0x1cf   : > { %v1400_v27 = vpop.f32.mrf.mxu2 }
 0x1d0   : > { %1535 = vst [vmem:[#allocation2 + $0x38] sm:$0xff] %v1519_v26  ;;  %v1401_v61 = vadd.f32 %v1400_v27, %v1352_v11 }
 0x1d1   : > { %v1449_v37 = vpop.f32.mrf.mxu3  ;;  %v1353_v56 = vpop.f32.mrf.mxu1 }
 0x1d2   : > { %v1450_v38 = vadd.f32 %v1449_v37, %v1401_v61  ;;  %v1354_v39 = vadd.f32 %v1353_v56, %v2745_v28 }
 0x1d3   : > { %v1500_v40 = vpop.f32.mrf.mxu0 }
 0x1d4   : > { %v1499_v60 = vadd.f32 %v1498_v20, %v1450_v38 }
 0x1d6   : > { %v1520_v32 = vadd.f32 %v1499_v60, %v631_v17 }
 0x1d7   : > { %v1402_v58 = vpop.f32.mrf.mxu2 }
 0x1d8   : > { %1536 = vst [vmem:[#allocation2 + $0x60] sm:$0xff] %v1520_v32  ;;  %v1403_v14 = vadd.f32 %v1402_v58, %v1354_v39 }
 0x1d9   : > { %v1451_v43 = vpop.f32.mrf.mxu3  ;;  %v1356_v41 = vpop.f32.mrf.mxu1 }
 0x1da   : > { %v1452_v7 = vadd.f32 %v1451_v43, %v1403_v14  ;;  %v1357_v51 = vadd.f32 %v1356_v41, %v2748_v45 }
 0x1db   : > { %v1503_v21 = vpop.f32.mrf.mxu0 }
 0x1dc   : > { %v1501_v42 = vadd.f32 %v1500_v40, %v1452_v7 }
 0x1de   : > { %v1521_v49 = vadd.f32 %v1501_v42, %v632_v50 }
 0x1df   : > { %v1405_v34 = vpop.f32.mrf.mxu2 }
 0x1e0   : > { %1537 = vst [vmem:[#allocation2 + $0x70] sm:$0xff] %v1521_v49  ;;  %v1406_v52 = vadd.f32 %v1405_v34, %v1357_v51 }
 0x1e1   : > { %v1454_v30 = vpop.f32.mrf.mxu3  ;;  %v1358_v28 = vpop.f32.mrf.mxu1 }
 0x1e2   : > { %v1455_v3 = vadd.f32 %v1454_v30, %v1406_v52  ;;  %v1359_v57 = vadd.f32 %v1358_v28, %v2751_v25 }
 0x1e3   : > { %v1505_v48 = vpop.f32.mrf.mxu0 }
 0x1e4   : > { %v1504_v62 = vadd.f32 %v1503_v21, %v1455_v3 }
 0x1e6   : > { %v1522_v59 = vadd.f32 %v1504_v62, %v633_v53 }
 0x1e7   : > { %v1407_v4 = vpop.f32.mrf.mxu2 }
 0x1e8   : > { %1538 = vst [vmem:[#allocation2 + $0x78] sm:$0xff] %v1522_v59  ;;  %v1408_v63 = vadd.f32 %v1407_v4, %v1359_v57 }
 0x1e9   : > { %v1456_v0 = vpop.f32.mrf.mxu3 }
 0x1ea   : > { %v1457_v29 = vadd.f32 %v1456_v0, %v1408_v63 }
 0x1ec   : > { %v1506_v45 = vadd.f32 %v1505_v48, %v1457_v29  ;;  %1543 = sbr.rel (%p2062_p10) target bundleno = 513 (0x201), region = 40 }
 0x1ee   : > { %v1523_v47 = vadd.f32 %v1506_v45, %v634_v44 }
 0x1f0   : > { %1539 = vst [vmem:[#allocation2 + $0x28] sm:$0xff] %v1523_v47 }
 0x1f1   : > { %v1544_v2 = vld [vmem:[#allocation2 + $0x30] sm:$0xff]  ;;  %v1545_v5 = vld [vmem:[#allocation2] sm:$0xff]  ;;  %v1546_v25 = vld [vmem:[#allocation2 + $0x58] sm:$0xff] }
 0x1f2   : > { %v2286_v31 = vld [vmem:[%s2804_s2] ss:$0 sm:$0xff]  ;;  %v1547_v6 = vld [vmem:[#allocation2 + $0x18] sm:$0xff]  ;;  %v1548_v13 = vld [vmem:[#allocation2 + $0x50] sm:$0xff] }
 0x1f3   : > { %v1549_v8 = vld [vmem:[#allocation2 + $0x68] sm:$0xff]  ;;  %v1564_v15 = vadd.f32 %v2286_v31, %v1544_v2  ;;  %v1565_v33 = vadd.f32 %v2286_v31, %v1545_v5  ;;  %v1566_v35 = vadd.f32 %v2286_v31, %v1546_v25  ;;  %v1567_v22 = vadd.f32 %v2286_v31, %v1547_v6  ;;  %v1552_v46 = vld [vmem:[#allocation2 + $0x40] sm:$0xff]  ;;  %v1554_v12 = vld [vmem:[#allocation2 + $0x10] sm:$0xff] }
 0x1f4   : > { %v1550_v9 = vld [vmem:[#allocation2 + $0x8] sm:$0xff]  ;;  %v1568_v1 = vadd.f32 %v2286_v31, %v1548_v13  ;;  %v1569_v10 = vadd.f32 %v2286_v31, %v1549_v8  ;;  %v1553_v36 = vld [vmem:[#allocation2 + $0x20] sm:$0xff]  ;;  %v1555_v20 = vld [vmem:[#allocation2 + $0x38] sm:$0xff]  ;;  %v1572_v60 = vadd.f32 %v2286_v31, %v1552_v46  ;;  %v1574_v43 = vadd.f32 %v2286_v31, %v1554_v12 }
 0x1f5   : > { %v1551_v18 = vld [vmem:[#allocation2 + $0x48] sm:$0xff]  ;;  %v1570_v16 = vadd.f32 %v2286_v31, %v1550_v9  ;;  %v1580_v54 = vmax.f32 %v1564_v15, 0.0  ;;  %v1581_v23 = vmax.f32 %v1565_v33, 0.0  ;;  %v1582_v19 = vmax.f32 %v1566_v35, 0.0  ;;  %v1556_v37 = vld [vmem:[#allocation2 + $0x60] sm:$0xff]  ;;  %v1557_v56 = vld [vmem:[#allocation2 + $0x70] sm:$0xff] }
 0x1f6   : > { %v1571_v55 = vadd.f32 %v2286_v31, %v1551_v18  ;;  %v1583_v24 = vmax.f32 %v1567_v22, 0.0  ;;  %v1584_v26 = vmax.f32 %v1568_v1, 0.0  ;;  %v1585_v11 = vmax.f32 %v1569_v10, 0.0  ;;  %v1558_v39 = vld [vmem:[#allocation2 + $0x78] sm:$0xff] }
 0x1f7   : > { %v1586_v27 = vmax.f32 %v1570_v16, 0.0  ;;  %v2157_v38 = vpack.c.bf16 %v1581_v23, %v1580_v54  ;;  %v1573_v32 = vadd.f32 %v2286_v31, %v1553_v36  ;;  %v1559_v40 = vld [vmem:[#allocation2 + $0x28] sm:$0xff]  ;;  %v1575_v41 = vadd.f32 %v2286_v31, %v1555_v20 }
 0x1f8   : > { %v1587_v61 = vmax.f32 %v1571_v55, 0.0  ;;  %v2162_v17 = vpack.c.bf16 %v1583_v24, %v1582_v19  ;;  %v2167_v58 = vpack.c.bf16 %v1585_v11, %v1584_v26  ;;  %v1588_v7 = vmax.f32 %v1572_v60, 0.0 }
 0x1f9   : > { %2158 = vst [vmem:[%s2422_s9] sm:$0xff] %v2157_v38   ;;  %v1589_v50 = vmax.f32 %v1573_v32, 0.0  ;;  %v1576_v42 = vadd.f32 %v2286_v31, %v1556_v37  ;;  %v1577_v49 = vadd.f32 %v2286_v31, %v1557_v56  ;;  %v1590_v51 = vmax.f32 %v1574_v43, 0.0 }
 0x1fa   : > { %v2172_v14 = vpack.c.bf16 %v1587_v61, %v1586_v27  ;;  %2196 = vst [vmem:[%s2422_s9 + $0x8] sm:$0xff] %v2162_v17   ;;  %v1591_v34 = vmax.f32 %v1575_v41, 0.0  ;;  %v1578_v52 = vadd.f32 %v2286_v31, %v1558_v39  ;;  %v1579_v30 = vadd.f32 %v2286_v31, %v1559_v40 }
 0x1fb   : > { %2197 = vst [vmem:[%s2422_s9 + $0x10] sm:$0xff] %v2167_v58   ;;  %v2177_v21 = vpack.c.bf16 %v1589_v50, %v1588_v7  ;;  %v1592_v3 = vmax.f32 %v1576_v42, 0.0  ;;  %v1593_v53 = vmax.f32 %v1577_v49, 0.0 }
 0x1fc   : > { %2198 = vst [vmem:[%s2422_s9 + $0x18] sm:$0xff] %v2172_v14   ;;  %v2182_v28 = vpack.c.bf16 %v1591_v34, %v1590_v51  ;;  %v1594_v62 = vmax.f32 %v1578_v52, 0.0  ;;  %v1595_v59 = vmax.f32 %v1579_v30, 0.0 }
 0x1fd   : > { %2199 = vst [vmem:[%s2422_s9 + $0x20] sm:$0xff] %v2177_v21   ;;  %v2187_v57 = vpack.c.bf16 %v1593_v53, %v1592_v3 }
 0x1fe   : > { %2200 = vst [vmem:[%s2422_s9 + $0x28] sm:$0xff] %v2182_v28   ;;  %v2192_v4 = vpack.c.bf16 %v1595_v59, %v1594_v62 }
 0x1ff   : > { %2201 = vst [vmem:[%s2422_s9 + $0x30] sm:$0xff] %v2187_v57  }
 0x200   : > { %2202 = vst [vmem:[%s2422_s9 + $0x38] sm:$0xff] %v2192_v4  }
 0x201 PF: > { %s13_s18 = sadd.s32 1, %s2341_s18   ;;  %s2806_s12 = smov %s2329_s15 }
 0x202   : > { %p10_p11 = scmp.ge.s32.totalorder %s13_s18, 50   ;;  %s2807_s13 = smov %s2333_s16 }
 0x203   : > { %s2808_s14 = smov %s2337_s17  ;;  %s2809_s15 = smov %s2813_s19 }
 0x204   : > { %s2810_s16 = smov %s2817_s20  ;;  %s2811_s17 = smov %s2821_s21 }
 0x205   :  { %12 = sbr.rel (!%p10_p11) target bundleno = 4 (0x4), region = 71 }

</bundles_post_ra>
